<compile_context>
chip_gen: v7x
topology: tpu7x:2x2x1
jax: 0.10.0
libtpu: 0.0.40
codegen_flags: <defaults>
</compile_context>

<pallas_src>
import jax
import jax.numpy as jnp
import numpy as np
from jax import lax
from jax.experimental import pallas as pl
from jax.experimental.pallas import tpu as pltpu


MXU_DTYPE = jnp.bfloat16          # MXU operands; accumulation stays f32


def _dot(a, b):
    return jnp.dot(a, b, preferred_element_type=jnp.float32)


def _layernorm(x, g, b, eps=1e-5):
    mu = jnp.mean(x, axis=-1, keepdims=True)
    var = jnp.mean(jnp.square(x - mu), axis=-1, keepdims=True)
    return (x - mu) * lax.rsqrt(var + eps) * g + b


# --------------------------- host-side param packing ------------------------

def pack_params(params):
    """Pack all parameters into 3 slabs + a static layout (python ints only).

    Returns ((w_conv bf16, w_fc f32, vec f32), layout).
    Conv weights are stored 2D as (K*Cin, Cout) (tap-major), column-concatenated
    over all convs; biases + LN gamma/beta live in one (1, N) f32 slab.
    """
    dn = params["densenet"]
    blocks = dn["blocks"]
    w_last, b_last = dn["conv_last"]
    depth, width = len(blocks), len(blocks[0])
    emb_dim = int(blocks[0][0][0].shape[1])

    conv_list = []
    for i in range(depth):
        for j in range(width):
            w, b = blocks[i][j]
            # 'same' conv halo sizing is only valid for odd kernel sizes
            # (matches the PyTorch module, whose shapes also require it).
            assert int(w.shape[0]) % 2 == 1, "DenseNet kernel sizes must be odd"
            conv_list.append((("dn", i, j), w, b))
    assert int(w_last.shape[0]) == 1        # module hard-codes ks=1
    conv_list.append((("last",), w_last, b_last))
    n_tc = len(params["textcnn"]["convs"])
    for n, (w, b) in enumerate(params["textcnn"]["convs"]):
        conv_list.append((("tc", n), w, b))

    r_max = max(int(w.shape[0] * w.shape[1]) for _, w, _ in conv_list)
    c_tot = sum(int(w.shape[2]) for _, w, _ in conv_list)
    wconv = np.zeros((r_max, c_tot), np.float32)

    vec_chunks = []
    vec_off = 0

    def add_vec(v):
        nonlocal vec_off
        v = np.asarray(v, np.float32).reshape(-1)
        off = vec_off
        vec_chunks.append(v)
        vec_off += int(v.shape[0])
        return off

    conv_specs, c_off = {}, 0
    for key, w, b in conv_list:
        K, Cin, Cout = (int(s) for s in w.shape)
        wconv[:K * Cin, c_off:c_off + Cout] = (
            np.asarray(w, np.float32).reshape(K * Cin, Cout))
        conv_specs[key] = dict(K=K, Cin=Cin, Cout=Cout, c0=c_off, b0=add_vec(b))
        c_off += Cout

    (w_h, b_h), (w_o, b_o) = params["fc_hidden"], params["fc"]
    r_fc = max(int(w_h.shape[0]), int(w_o.shape[0]))
    wfc = np.zeros((r_fc, int(w_h.shape[1]) + int(w_o.shape[1])), np.float32)
    wfc[:int(w_h.shape[0]), :int(w_h.shape[1])] = np.asarray(w_h, np.float32)
    wfc[:int(w_o.shape[0]), int(w_h.shape[1]):] = np.asarray(w_o, np.float32)
    fc_hidden = dict(Din=int(w_h.shape[0]), Dout=int(w_h.shape[1]), c0=0,
                     b0=add_vec(b_h))
    fc = dict(Din=int(w_o.shape[0]), Dout=int(w_o.shape[1]),
              c0=int(w_h.shape[1]), b0=add_vec(b_o))

    def add_ln(name):
        g, b = params[name]
        return (add_vec(g), add_vec(b), int(np.asarray(g).size))

    ln_dn = add_ln("ln_densenet")
    ln_tc = add_ln("ln_textcnn")
    ln_fc = add_ln("ln_fc_hidden")

    vecs = np.concatenate(vec_chunks)[None, :].astype(np.float32)

    pad_max = max(((conv_specs[k]["K"] - 1) // 2
                   for k in conv_specs if k[0] == "dn"), default=0)
    # widest input of any depth>=1 conv (the column prefix of results)
    col_res_w = max((int(blocks[i][0][0].shape[1]) for i in range(1, depth)),
                    default=0)

    layout = dict(
        depth=depth, width=width, emb_dim=emb_dim,
        dn=[[conv_specs[("dn", i, j)] for j in range(width)]
            for i in range(depth)],
        conv_last=conv_specs[("last",)],
        tc=[conv_specs[("tc", n)] for n in range(n_tc)],
        fc_hidden=fc_hidden, fc=fc,
        ln_dn=ln_dn, ln_tc=ln_tc, ln_fc=ln_fc,
        pad_max=pad_max,
        xpad_w=emb_dim + col_res_w,
        t_dim=sum(conv_specs[("tc", n)]["Cout"] for n in range(n_tc)),
    )
    slabs = (jnp.asarray(wconv).astype(jnp.bfloat16),   # one-time host cast
             jnp.asarray(wfc, dtype=jnp.float32),
             jnp.asarray(vecs, dtype=jnp.float32))
    return slabs, layout


# --------------------------------- kernel -----------------------------------

def _make_kernel(layout, S):
    pad_max = layout["pad_max"]
    emb = layout["emb_dim"]

    def kernel(emb_ref, mask_ref, wconv_ref, wfc_ref, vec_ref,
               out_ref, xpad_ref, tcat_ref):
        x = emb_ref[0]            # (S, H)  f32
        mask = mask_ref[0]        # (S, 1)  f32

        def bias(spec, n):
            return vec_ref[0:1, spec["b0"]:spec["b0"] + n]

        def ln(xv, sp):
            g0, b0, D = sp
            return _layernorm(xv, vec_ref[0:1, g0:g0 + D],
                              vec_ref[0:1, b0:b0 + D])

        def dn_conv(spec, in_lo):
            """'same' conv over the lane-dense slab slice [in_lo, in_lo+Cin)."""
            K, Cin, Cout, c0 = spec["K"], spec["Cin"], spec["Cout"], spec["c0"]
            pad = (K - 1) // 2
            acc = None
            for k in range(K):
                s0 = pad_max - pad + k
                xk = xpad_ref[s0:s0 + S, in_lo:in_lo + Cin].astype(MXU_DTYPE)
                part = _dot(xk, wconv_ref[k * Cin:(k + 1) * Cin, c0:c0 + Cout])
                acc = part if acc is None else acc + part
            # bias -> mask -> ReLU (hoisted out of the tap loop; matches PyTorch)
            return jnp.maximum((acc + bias(spec, Cout)) * mask, 0.0)

        # -- scratch prep: zero ONLY the halo rows (interior is always written).
        if pad_max > 0:
            zc = xpad_ref.shape[1]
            xpad_ref[0:pad_max, :] = jnp.zeros((pad_max, zc), jnp.float32)
            xpad_ref[pad_max + S:, :] = jnp.zeros((pad_max, zc), jnp.float32)
        # embeddings written into the slab exactly once
        xpad_ref[pad_max:pad_max + S, 0:emb] = x

        # ---- DenseNet ----
        depth, width = layout["depth"], layout["width"]
        merges = []
        for j in range(width):
            res_off = emb             # column results live at lanes [emb, ...)
            r = None
            for i in range(depth):
                spec = layout["dn"][i][j]
                r = dn_conv(spec, 0 if i == 0 else emb)
                if i < depth - 1:     # feeds the next conv of this column
                    xpad_ref[pad_max:pad_max + S,
                             res_off:res_off + spec["Cout"]] = r
                    res_off += spec["Cout"]
            merges.append(r)

        # conv_last: kernel_size 1 -> channel concat == a short sum of chunk dots
        cl = layout["conv_last"]
        acc, r_off = None, 0
        for chunk in [x] + merges:
            ci = chunk.shape[-1]
            part = _dot(chunk.astype(MXU_DTYPE),
                        wconv_ref[r_off:r_off + ci,
                                  cl["c0"]:cl["c0"] + cl["Cout"]])
            acc = part if acc is None else acc + part
            r_off += ci
        d = jnp.maximum((acc + bias(cl, cl["Cout"])) * mask, 0.0)
        d = ln(d, layout["ln_dn"])

        # ---- TextCNN: valid conv + ReLU + max-over-time, packed into tcat ----
        t_off = 0
        for spec in layout["tc"]:
            K, Cin, Cout, c0 = spec["K"], spec["Cin"], spec["Cout"], spec["c0"]
            L = S - K + 1
            acc = None
            for k in range(K):
                xk = d[k:k + L, :].astype(MXU_DTYPE)
                part = _dot(xk, wconv_ref[k * Cin:(k + 1) * Cin, c0:c0 + Cout])
                acc = part if acc is None else acc + part
            y = jnp.maximum(acc + bias(spec, Cout), 0.0)
            tcat_ref[0:1, t_off:t_off + Cout] = jnp.max(y, axis=0, keepdims=True)
            t_off += Cout
        t = ln(tcat_ref[...], layout["ln_tc"])

        # ---- heads (kept in f32: tiny, keeps accuracy) ----
        fh = layout["fc_hidden"]
        h = _dot(t, wfc_ref[0:fh["Din"], fh["c0"]:fh["c0"] + fh["Dout"]]) \
            + vec_ref[0:1, fh["b0"]:fh["b0"] + fh["Dout"]]
        h = ln(h, layout["ln_fc"])
        fo = layout["fc"]
        out = _dot(h, wfc_ref[0:fo["Din"], fo["c0"]:fo["c0"] + fo["Dout"]]) \
            + vec_ref[0:1, fo["b0"]:fo["b0"] + fo["Dout"]]
        out_ref[0] = out.astype(out_ref.dtype)       # only HBM store per step

    return kernel


def make_forward(layout):
    """Build the jitted fused forward: (wconv, wfc, vecs, embedded, mask) -> logits."""
    pad_max = layout["pad_max"]
    label = layout["fc"]["Dout"]

    @jax.jit
    def forward(wconv, wfc, vecs, embedded, mask):
        B, S, H = embedded.shape
        mask_f = mask.astype(jnp.float32)[:, :, None]        # (B, S, 1)
        kernel = _make_kernel(layout, S)
        out = pl.pallas_call(
            kernel,
            grid=(B,),
            in_specs=[
                pl.BlockSpec((1, S, H), lambda b: (b, 0, 0)),   # embedded row
                pl.BlockSpec((1, S, 1), lambda b: (b, 0, 0)),   # mask row
                # parameter slabs: constant block index -> fetched once, resident
                pl.BlockSpec(tuple(wconv.shape), lambda b: (0, 0)),
                pl.BlockSpec(tuple(wfc.shape), lambda b: (0, 0)),
                pl.BlockSpec(tuple(vecs.shape), lambda b: (0, 0)),
            ],
            out_specs=pl.BlockSpec((1, 1, label), lambda b: (b, 0, 0)),
            out_shape=jax.ShapeDtypeStruct((B, 1, label), jnp.float32),
            scratch_shapes=[
                # 'same'-conv halo slab: [0:emb)=x, [emb:...)=column results
                pltpu.VMEM((S + 2 * pad_max, layout["xpad_w"]), jnp.float32),
                # TextCNN pooled-output slab (replaces a post-call concat)
                pltpu.VMEM((1, layout["t_dim"]), jnp.float32),
            ],
            compiler_params=pltpu.CompilerParams(
                dimension_semantics=("parallel",),       # megacore on v7x
                vmem_limit_bytes=32 * 1024 * 1024),
        )(embedded, mask_f, wconv, wfc, vecs)
        return out[:, 0, :]

    return forward


# ----------------------------- pure-JAX reference ---------------------------

_HP = lax.Precision.HIGHEST


def _ref_conv1d_mask_relu(x, w, b, mask):
    K, S = w.shape[0], x.shape[1]
    pad = (K - 1) // 2
    xp = jnp.pad(x, ((0, 0), (pad, K - 1 - pad), (0, 0)))
    acc = sum(jnp.einsum("bsc,cd->bsd", xp[:, k:k + S, :], w[k], precision=_HP)
              for k in range(K)) + b
    return jnp.maximum(acc * mask, 0.0)


def _ref_conv_relu_maxpool(x, w, b):
    K, S = w.shape[0], x.shape[1]
    L = S - K + 1
    acc = sum(jnp.einsum("blc,cd->bld", x[:, k:k + L, :], w[k], precision=_HP)
              for k in range(K)) + b
    return jnp.max(jnp.maximum(acc, 0.0), axis=1)


def _ref_layernorm(x, g, b):
    mu = jnp.mean(x, axis=-1, keepdims=True)
    var = jnp.mean(jnp.square(x - mu), axis=-1, keepdims=True)
    return (x - mu) * lax.rsqrt(var + 1e-5) * g + b


def ref_forward(params, embedded, mask):
    mask_f = mask.astype(jnp.float32)[:, :, None]
    p = params["densenet"]
    width = len(p["blocks"][0])
    merge_list = []
    for j in range(width):
        conv_results = []
        for i, convs in enumerate(p["blocks"]):
            conv_in = embedded if i == 0 else jnp.concatenate(conv_results, axis=-1)
            w, b = convs[j]
            conv_results.append(_ref_conv1d_mask_relu(conv_in, w, b, mask_f))
        merge_list.append(conv_results[-1])
    w, b = p["conv_last"]
    d = _ref_conv1d_mask_relu(jnp.concatenate([embedded] + merge_list, axis=-1),
                              w, b, mask_f)
    d = _ref_layernorm(d, *params["ln_densenet"])
    t = jnp.concatenate([_ref_conv_relu_maxpool(d, w, b)
                         for (w, b) in params["textcnn"]["convs"]], axis=1)
    t = _ref_layernorm(t, *params["ln_textcnn"])
    h = jnp.dot(t, params["fc_hidden"][0], precision=_HP) + params["fc_hidden"][1]
    h = _ref_layernorm(h, *params["ln_fc_hidden"])
    return jnp.dot(h, params["fc"][0], precision=_HP) + params["fc"][1]


# --------------------------------- param init -------------------------------

def _init_conv(key, K, Cin, Cout):
    kw, kb = jax.random.split(key)
    bound = 1.0 / np.sqrt(Cin * K)
    w = jax.random.uniform(kw, (K, Cin, Cout), jnp.float32, -bound, bound)
    b = jax.random.uniform(kb, (1, Cout), jnp.float32, -bound, bound)
    return w, b


def _init_linear(key, Din, Dout):
    kw, kb = jax.random.split(key)
    bound = 1.0 / np.sqrt(Din)
    w = jax.random.uniform(kw, (Din, Dout), jnp.float32, -bound, bound)
    b = jax.random.uniform(kb, (1, Dout), jnp.float32, -bound, bound)
    return w, b


def _init_layernorm(D):
    return jnp.ones((1, D), jnp.float32), jnp.zeros((1, D), jnp.float32)


def build_params(cfg, key):
    keys = iter(jax.random.split(key, 64))
    emb_dim = cfg["emb_dim"]
    dk = cfg["densenet_kernels"]
    width = len(dk[0])
    first_nf, nf, last_nf = (cfg["densenet_first_num_filters"],
                             cfg["densenet_num_filters"],
                             cfg["densenet_last_num_filters"])
    blocks = []
    for i, kss in enumerate(dk):
        in_ch = emb_dim if i == 0 else first_nf + nf * (i - 1)
        out_ch = first_nf if i == 0 else nf
        blocks.append([_init_conv(next(keys), ks, in_ch, out_ch) for ks in kss])
    conv_last = _init_conv(next(keys), 1, emb_dim + nf * width, last_nf)

    textcnn_convs = [_init_conv(next(keys), ks, last_nf, cfg["num_filters"])
                     for ks in cfg["kernel_sizes"]]
    textcnn_last_dim = len(cfg["kernel_sizes"]) * cfg["num_filters"]

    return {
        "densenet": {"blocks": blocks, "conv_last": conv_last},
        "ln_densenet": _init_layernorm(last_nf),
        "textcnn": {"convs": textcnn_convs},
        "ln_textcnn": _init_layernorm(textcnn_last_dim),
        "fc_hidden": _init_linear(next(keys), textcnn_last_dim, cfg["fc_hidden_size"]),
        "ln_fc_hidden": _init_layernorm(cfg["fc_hidden_size"]),
        "fc": _init_linear(next(keys), cfg["fc_hidden_size"], cfg["label_size"]),
    }


# ------------------------------------ main -----------------------------------

if __name__ == "__main__":
    cfg = dict(
        batch=2, seq=16, emb_dim=32,                 # emb_dim == bert hidden_size
        densenet_kernels=[[3, 5], [3, 5]],           # depth 2, width 2 (odd -> 'same')
        densenet_first_num_filters=16,
        densenet_num_filters=16,
        densenet_last_num_filters=32,
        num_filters=16, kernel_sizes=[2, 3],
        fc_hidden_size=32, label_size=5,
    )

    key = jax.random.PRNGKey(0)
    k_p, k_x, k_len = jax.random.split(key, 3)
    params = build_params(cfg, k_p)

    B, S, H = cfg["batch"], cfg["seq"], cfg["emb_dim"]
    embedded = jax.random.normal(k_x, (B, S, H), jnp.float32)   # BERT last_hidden_state stand-in
    lengths = jax.random.randint(k_len, (B,), S // 2, S + 1)
    mask = (jnp.arange(S)[None, :] < lengths[:, None]).astype(jnp.float32)  # (B, S)

    slabs, layout = pack_params(params)        # one-time host-side packing / bf16 cast
    forward = make_forward(layout)

    out = forward(*slabs, embedded, mask)
    jax.block_until_ready(out)

    # Reference is f32 (HIGHEST); the kernel uses bf16 MXU operands with f32
    # accumulation on the conv path (heads stay f32), hence the tolerance.
    ref = ref_forward(params, embedded, mask)
    np.testing.assert_allclose(np.asarray(out), np.asarray(ref), rtol=3e-2, atol=3e-2)
    assert out.shape == (B, cfg["label_size"])

    print("KERNEL_OK")
</pallas_src>

<mosaic_0001>
module attributes {stable_mosaic.version = 11 : i64} {
  func.func @kernel(%arg0: i32, %arg1: memref<1x16x32xf32, #tpu.memory_space<vmem>>, %arg2: memref<1x16x1xf32, #tpu.memory_space<vmem>>, %arg3: memref<160x128xbf16, #tpu.memory_space<vmem>>, %arg4: memref<32x37xf32, #tpu.memory_space<vmem>>, %arg5: memref<1x357xf32, #tpu.memory_space<vmem>>, %arg6: memref<1x1x5xf32, #tpu.memory_space<vmem>>, %arg7: memref<20x48xf32, #tpu.memory_space<vmem>>, %arg8: memref<1x32xf32, #tpu.memory_space<vmem>>) attributes {dimension_semantics = [#tpu.dimension_semantics<parallel>], iteration_bounds = array<i64: 2>, scalar_prefetch = 0 : i64, scratch_operands = 2 : i64, tpu.core_type = #tpu.core_type<tc>, window_params = [{transform_indices = @transform_0, window_bounds = array<i64: 1, 16, 32>}, {transform_indices = @transform_1, window_bounds = array<i64: 1, 16, 1>}, {pipeline_mode = #tpu.pipeline_mode<synchronous>, transform_indices = @transform_2, window_bounds = array<i64: 160, 128>}, {pipeline_mode = #tpu.pipeline_mode<synchronous>, transform_indices = @transform_3, window_bounds = array<i64: 32, 37>}, {pipeline_mode = #tpu.pipeline_mode<synchronous>, transform_indices = @transform_4, window_bounds = array<i64: 1, 357>}, {transform_indices = @transform_5, window_bounds = array<i64: 1, 1, 5>}]} {
    %c0 = arith.constant 0 : index
    %c0_0 = arith.constant 0 : index
    %c0_1 = arith.constant 0 : index
    %0 = vector.load %arg1[%c0, %c0_0, %c0_1] : memref<1x16x32xf32, #tpu.memory_space<vmem>>, vector<1x16x32xf32>
    %1 = vector.shape_cast %0 : vector<1x16x32xf32> to vector<16x32xf32>
    %c0_2 = arith.constant 0 : index
    %c0_3 = arith.constant 0 : index
    %c0_4 = arith.constant 0 : index
    %2 = vector.load %arg2[%c0_2, %c0_3, %c0_4] : memref<1x16x1xf32, #tpu.memory_space<vmem>>, vector<1x16x1xf32>
    %3 = vector.shape_cast %2 : vector<1x16x1xf32> to vector<16x1xf32>
    %cst = arith.constant 0.000000e+00 : f32
    %4 = vector.broadcast %cst : f32 to vector<2x48xf32>
    %c0_5 = arith.constant 0 : index
    %c0_6 = arith.constant 0 : index
    %5 = vector.load %arg7[%c0_5, %c0_6] : memref<20x48xf32, #tpu.memory_space<vmem>>, vector<2x48xf32>
    tpu.vector_store %arg7[%c0_5, %c0_6], %4 {strides = array<i32>} : memref<20x48xf32, #tpu.memory_space<vmem>>, vector<2x48xf32>,
    %cst_7 = arith.constant 0.000000e+00 : f32
    %6 = vector.broadcast %cst_7 : f32 to vector<2x48xf32>
    %c18 = arith.constant 18 : index
    %c0_8 = arith.constant 0 : index
    %7 = vector.load %arg7[%c18, %c0_8] : memref<20x48xf32, #tpu.memory_space<vmem>>, vector<2x48xf32>
    tpu.vector_store %arg7[%c18, %c0_8], %6 {strides = array<i32>} : memref<20x48xf32, #tpu.memory_space<vmem>>, vector<2x48xf32>,
    %c2 = arith.constant 2 : index
    %c0_9 = arith.constant 0 : index
    %8 = vector.load %arg7[%c2, %c0_9] : memref<20x48xf32, #tpu.memory_space<vmem>>, vector<16x32xf32>
    tpu.vector_store %arg7[%c2, %c0_9], %1 {strides = array<i32>} : memref<20x48xf32, #tpu.memory_space<vmem>>, vector<16x32xf32>,
    %c1 = arith.constant 1 : index
    %c0_10 = arith.constant 0 : index
    %9 = vector.load %arg7[%c1, %c0_10] : memref<20x48xf32, #tpu.memory_space<vmem>>, vector<16x32xf32>
    %10 = arith.truncf %9 : vector<16x32xf32> to vector<16x32xbf16>
    %c0_11 = arith.constant 0 : index
    %c0_12 = arith.constant 0 : index
    %11 = vector.load %arg3[%c0_11, %c0_12] : memref<160x128xbf16, #tpu.memory_space<vmem>>, vector<32x16xbf16>
    %cst_13 = arith.constant dense<0.000000e+00> : vector<16x16xf32>
    %12 = tpu.matmul %10, %11, %cst_13 {dimension_numbers = #tpu.dot_dimension_numbers<[1], [0], [0], [1], [0, 0, 1, 1], [], []>} : vector<16x32xbf16>, vector<32x16xbf16>, vector<16x16xf32> -> vector<16x16xf32>
    %c2_14 = arith.constant 2 : index
    %c0_15 = arith.constant 0 : index
    %13 = vector.load %arg7[%c2_14, %c0_15] : memref<20x48xf32, #tpu.memory_space<vmem>>, vector<16x32xf32>
    %14 = arith.truncf %13 : vector<16x32xf32> to vector<16x32xbf16>
    %c32 = arith.constant 32 : index
    %c0_16 = arith.constant 0 : index
    %15 = vector.load %arg3[%c32, %c0_16] : memref<160x128xbf16, #tpu.memory_space<vmem>>, vector<32x16xbf16>
    %cst_17 = arith.constant dense<0.000000e+00> : vector<16x16xf32>
    %16 = tpu.matmul %14, %15, %cst_17 {dimension_numbers = #tpu.dot_dimension_numbers<[1], [0], [0], [1], [0, 0, 1, 1], [], []>} : vector<16x32xbf16>, vector<32x16xbf16>, vector<16x16xf32> -> vector<16x16xf32>
    %17 = arith.addf %12, %16 : vector<16x16xf32>
    %c3 = arith.constant 3 : index
    %c0_18 = arith.constant 0 : index
    %18 = vector.load %arg7[%c3, %c0_18] : memref<20x48xf32, #tpu.memory_space<vmem>>, vector<16x32xf32>
    %19 = arith.truncf %18 : vector<16x32xf32> to vector<16x32xbf16>
    %c64 = arith.constant 64 : index
    %c0_19 = arith.constant 0 : index
    %20 = vector.load %arg3[%c64, %c0_19] : memref<160x128xbf16, #tpu.memory_space<vmem>>, vector<32x16xbf16>
    %cst_20 = arith.constant dense<0.000000e+00> : vector<16x16xf32>
    %21 = tpu.matmul %19, %20, %cst_20 {dimension_numbers = #tpu.dot_dimension_numbers<[1], [0], [0], [1], [0, 0, 1, 1], [], []>} : vector<16x32xbf16>, vector<32x16xbf16>, vector<16x16xf32> -> vector<16x16xf32>
    %22 = arith.addf %17, %21 : vector<16x16xf32>
    %c0_21 = arith.constant 0 : index
    %c0_22 = arith.constant 0 : index
    %23 = vector.load %arg5[%c0_21, %c0_22] : memref<1x357xf32, #tpu.memory_space<vmem>>, vector<1x16xf32>
    %24 = vector.broadcast %23 : vector<1x16xf32> to vector<16x16xf32>
    %25 = arith.addf %22, %24 : vector<16x16xf32>
    %26 = vector.broadcast %3 : vector<16x1xf32> to vector<16x16xf32>
    %27 = arith.mulf %25, %26 : vector<16x16xf32>
    %cst_23 = arith.constant 0.000000e+00 : f32
    %28 = vector.broadcast %cst_23 : f32 to vector<16x16xf32>
    %29 = arith.maximumf %27, %28 : vector<16x16xf32>
    %c2_24 = arith.constant 2 : index
    %c32_25 = arith.constant 32 : index
    %30 = vector.load %arg7[%c2_24, %c32_25] : memref<20x48xf32, #tpu.memory_space<vmem>>, vector<16x16xf32>
    tpu.vector_store %arg7[%c2_24, %c32_25], %29 {strides = array<i32>} : memref<20x48xf32, #tpu.memory_space<vmem>>, vector<16x16xf32>,
    %c1_26 = arith.constant 1 : index
    %c32_27 = arith.constant 32 : index
    %31 = vector.load %arg7[%c1_26, %c32_27] : memref<20x48xf32, #tpu.memory_space<vmem>>, vector<16x16xf32>
    %32 = arith.truncf %31 : vector<16x16xf32> to vector<16x16xbf16>
    %c0_28 = arith.constant 0 : index
    %c32_29 = arith.constant 32 : index
    %33 = vector.load %arg3[%c0_28, %c32_29] : memref<160x128xbf16, #tpu.memory_space<vmem>>, vector<16x16xbf16>
    %cst_30 = arith.constant dense<0.000000e+00> : vector<16x16xf32>
    %34 = tpu.matmul %32, %33, %cst_30 {dimension_numbers = #tpu.dot_dimension_numbers<[1], [0], [0], [1], [0, 0, 1, 1], [], []>} : vector<16x16xbf16>, vector<16x16xbf16>, vector<16x16xf32> -> vector<16x16xf32>
    %c2_31 = arith.constant 2 : index
    %c32_32 = arith.constant 32 : index
    %35 = vector.load %arg7[%c2_31, %c32_32] : memref<20x48xf32, #tpu.memory_space<vmem>>, vector<16x16xf32>
    %36 = arith.truncf %35 : vector<16x16xf32> to vector<16x16xbf16>
    %c16 = arith.constant 16 : index
    %c32_33 = arith.constant 32 : index
    %37 = vector.load %arg3[%c16, %c32_33] : memref<160x128xbf16, #tpu.memory_space<vmem>>, vector<16x16xbf16>
    %cst_34 = arith.constant dense<0.000000e+00> : vector<16x16xf32>
    %38 = tpu.matmul %36, %37, %cst_34 {dimension_numbers = #tpu.dot_dimension_numbers<[1], [0], [0], [1], [0, 0, 1, 1], [], []>} : vector<16x16xbf16>, vector<16x16xbf16>, vector<16x16xf32> -> vector<16x16xf32>
    %39 = arith.addf %34, %38 : vector<16x16xf32>
    %c3_35 = arith.constant 3 : index
    %c32_36 = arith.constant 32 : index
    %40 = vector.load %arg7[%c3_35, %c32_36] : memref<20x48xf32, #tpu.memory_space<vmem>>, vector<16x16xf32>
    %41 = arith.truncf %40 : vector<16x16xf32> to vector<16x16xbf16>
    %c32_37 = arith.constant 32 : index
    %c32_38 = arith.constant 32 : index
    %42 = vector.load %arg3[%c32_37, %c32_38] : memref<160x128xbf16, #tpu.memory_space<vmem>>, vector<16x16xbf16>
    %cst_39 = arith.constant dense<0.000000e+00> : vector<16x16xf32>
    %43 = tpu.matmul %41, %42, %cst_39 {dimension_numbers = #tpu.dot_dimension_numbers<[1], [0], [0], [1], [0, 0, 1, 1], [], []>} : vector<16x16xbf16>, vector<16x16xbf16>, vector<16x16xf32> -> vector<16x16xf32>
    %44 = arith.addf %39, %43 : vector<16x16xf32>
    %c0_40 = arith.constant 0 : index
    %c32_41 = arith.constant 32 : index
    %45 = vector.load %arg5[%c0_40, %c32_41] : memref<1x357xf32, #tpu.memory_space<vmem>>, vector<1x16xf32>
    %46 = vector.broadcast %45 : vector<1x16xf32> to vector<16x16xf32>
    %47 = arith.addf %44, %46 : vector<16x16xf32>
    %48 = vector.broadcast %3 : vector<16x1xf32> to vector<16x16xf32>
    %49 = arith.mulf %47, %48 : vector<16x16xf32>
    %cst_42 = arith.constant 0.000000e+00 : f32
    %50 = vector.broadcast %cst_42 : f32 to vector<16x16xf32>
    %51 = arith.maximumf %49, %50 : vector<16x16xf32>
    %c0_43 = arith.constant 0 : index
    %c0_44 = arith.constant 0 : index
    %52 = vector.load %arg7[%c0_43, %c0_44] : memref<20x48xf32, #tpu.memory_space<vmem>>, vector<16x32xf32>
    %53 = arith.truncf %52 : vector<16x32xf32> to vector<16x32xbf16>
    %c0_45 = arith.constant 0 : index
    %c16_46 = arith.constant 16 : index
    %54 = vector.load %arg3[%c0_45, %c16_46] : memref<160x128xbf16, #tpu.memory_space<vmem>>, vector<32x16xbf16>
    %cst_47 = arith.constant dense<0.000000e+00> : vector<16x16xf32>
    %55 = tpu.matmul %53, %54, %cst_47 {dimension_numbers = #tpu.dot_dimension_numbers<[1], [0], [0], [1], [0, 0, 1, 1], [], []>} : vector<16x32xbf16>, vector<32x16xbf16>, vector<16x16xf32> -> vector<16x16xf32>
    %c1_48 = arith.constant 1 : index
    %c0_49 = arith.constant 0 : index
    %56 = vector.load %arg7[%c1_48, %c0_49] : memref<20x48xf32, #tpu.memory_space<vmem>>, vector<16x32xf32>
    %57 = arith.truncf %56 : vector<16x32xf32> to vector<16x32xbf16>
    %c32_50 = arith.constant 32 : index
    %c16_51 = arith.constant 16 : index
    %58 = vector.load %arg3[%c32_50, %c16_51] : memref<160x128xbf16, #tpu.memory_space<vmem>>, vector<32x16xbf16>
    %cst_52 = arith.constant dense<0.000000e+00> : vector<16x16xf32>
    %59 = tpu.matmul %57, %58, %cst_52 {dimension_numbers = #tpu.dot_dimension_numbers<[1], [0], [0], [1], [0, 0, 1, 1], [], []>} : vector<16x32xbf16>, vector<32x16xbf16>, vector<16x16xf32> -> vector<16x16xf32>
    %60 = arith.addf %55, %59 : vector<16x16xf32>
    %c2_53 = arith.constant 2 : index
    %c0_54 = arith.constant 0 : index
    %61 = vector.load %arg7[%c2_53, %c0_54] : memref<20x48xf32, #tpu.memory_space<vmem>>, vector<16x32xf32>
    %62 = arith.truncf %61 : vector<16x32xf32> to vector<16x32xbf16>
    %c64_55 = arith.constant 64 : index
    %c16_56 = arith.constant 16 : index
    %63 = vector.load %arg3[%c64_55, %c16_56] : memref<160x128xbf16, #tpu.memory_space<vmem>>, vector<32x16xbf16>
    %cst_57 = arith.constant dense<0.000000e+00> : vector<16x16xf32>
    %64 = tpu.matmul %62, %63, %cst_57 {dimension_numbers = #tpu.dot_dimension_numbers<[1], [0], [0], [1], [0, 0, 1, 1], [], []>} : vector<16x32xbf16>, vector<32x16xbf16>, vector<16x16xf32> -> vector<16x16xf32>
    %65 = arith.addf %60, %64 : vector<16x16xf32>
    %c3_58 = arith.constant 3 : index
    %c0_59 = arith.constant 0 : index
    %66 = vector.load %arg7[%c3_58, %c0_59] : memref<20x48xf32, #tpu.memory_space<vmem>>, vector<16x32xf32>
    %67 = arith.truncf %66 : vector<16x32xf32> to vector<16x32xbf16>
    %c96 = arith.constant 96 : index
    %c16_60 = arith.constant 16 : index
    %68 = vector.load %arg3[%c96, %c16_60] : memref<160x128xbf16, #tpu.memory_space<vmem>>, vector<32x16xbf16>
    %cst_61 = arith.constant dense<0.000000e+00> : vector<16x16xf32>
    %69 = tpu.matmul %67, %68, %cst_61 {dimension_numbers = #tpu.dot_dimension_numbers<[1], [0], [0], [1], [0, 0, 1, 1], [], []>} : vector<16x32xbf16>, vector<32x16xbf16>, vector<16x16xf32> -> vector<16x16xf32>
    %70 = arith.addf %65, %69 : vector<16x16xf32>
    %c4 = arith.constant 4 : index
    %c0_62 = arith.constant 0 : index
    %71 = vector.load %arg7[%c4, %c0_62] : memref<20x48xf32, #tpu.memory_space<vmem>>, vector<16x32xf32>
    %72 = arith.truncf %71 : vector<16x32xf32> to vector<16x32xbf16>
    %c128 = arith.constant 128 : index
    %c16_63 = arith.constant 16 : index
    %73 = vector.load %arg3[%c128, %c16_63] : memref<160x128xbf16, #tpu.memory_space<vmem>>, vector<32x16xbf16>
    %cst_64 = arith.constant dense<0.000000e+00> : vector<16x16xf32>
    %74 = tpu.matmul %72, %73, %cst_64 {dimension_numbers = #tpu.dot_dimension_numbers<[1], [0], [0], [1], [0, 0, 1, 1], [], []>} : vector<16x32xbf16>, vector<32x16xbf16>, vector<16x16xf32> -> vector<16x16xf32>
    %75 = arith.addf %70, %74 : vector<16x16xf32>
    %c0_65 = arith.constant 0 : index
    %c16_66 = arith.constant 16 : index
    %76 = vector.load %arg5[%c0_65, %c16_66] : memref<1x357xf32, #tpu.memory_space<vmem>>, vector<1x16xf32>
    %77 = vector.broadcast %76 : vector<1x16xf32> to vector<16x16xf32>
    %78 = arith.addf %75, %77 : vector<16x16xf32>
    %79 = vector.broadcast %3 : vector<16x1xf32> to vector<16x16xf32>
    %80 = arith.mulf %78, %79 : vector<16x16xf32>
    %cst_67 = arith.constant 0.000000e+00 : f32
    %81 = vector.broadcast %cst_67 : f32 to vector<16x16xf32>
    %82 = arith.maximumf %80, %81 : vector<16x16xf32>
    %c2_68 = arith.constant 2 : index
    %c32_69 = arith.constant 32 : index
    %83 = vector.load %arg7[%c2_68, %c32_69] : memref<20x48xf32, #tpu.memory_space<vmem>>, vector<16x16xf32>
    tpu.vector_store %arg7[%c2_68, %c32_69], %82 {strides = array<i32>} : memref<20x48xf32, #tpu.memory_space<vmem>>, vector<16x16xf32>,
    %c0_70 = arith.constant 0 : index
    %c32_71 = arith.constant 32 : index
    %84 = vector.load %arg7[%c0_70, %c32_71] : memref<20x48xf32, #tpu.memory_space<vmem>>, vector<16x16xf32>
    %85 = arith.truncf %84 : vector<16x16xf32> to vector<16x16xbf16>
    %c0_72 = arith.constant 0 : index
    %c48 = arith.constant 48 : index
    %86 = vector.load %arg3[%c0_72, %c48] : memref<160x128xbf16, #tpu.memory_space<vmem>>, vector<16x16xbf16>
    %cst_73 = arith.constant dense<0.000000e+00> : vector<16x16xf32>
    %87 = tpu.matmul %85, %86, %cst_73 {dimension_numbers = #tpu.dot_dimension_numbers<[1], [0], [0], [1], [0, 0, 1, 1], [], []>} : vector<16x16xbf16>, vector<16x16xbf16>, vector<16x16xf32> -> vector<16x16xf32>
    %c1_74 = arith.constant 1 : index
    %c32_75 = arith.constant 32 : index
    %88 = vector.load %arg7[%c1_74, %c32_75] : memref<20x48xf32, #tpu.memory_space<vmem>>, vector<16x16xf32>
    %89 = arith.truncf %88 : vector<16x16xf32> to vector<16x16xbf16>
    %c16_76 = arith.constant 16 : index
    %c48_77 = arith.constant 48 : index
    %90 = vector.load %arg3[%c16_76, %c48_77] : memref<160x128xbf16, #tpu.memory_space<vmem>>, vector<16x16xbf16>
    %cst_78 = arith.constant dense<0.000000e+00> : vector<16x16xf32>
    %91 = tpu.matmul %89, %90, %cst_78 {dimension_numbers = #tpu.dot_dimension_numbers<[1], [0], [0], [1], [0, 0, 1, 1], [], []>} : vector<16x16xbf16>, vector<16x16xbf16>, vector<16x16xf32> -> vector<16x16xf32>
    %92 = arith.addf %87, %91 : vector<16x16xf32>
    %c2_79 = arith.constant 2 : index
    %c32_80 = arith.constant 32 : index
    %93 = vector.load %arg7[%c2_79, %c32_80] : memref<20x48xf32, #tpu.memory_space<vmem>>, vector<16x16xf32>
    %94 = arith.truncf %93 : vector<16x16xf32> to vector<16x16xbf16>
    %c32_81 = arith.constant 32 : index
    %c48_82 = arith.constant 48 : index
    %95 = vector.load %arg3[%c32_81, %c48_82] : memref<160x128xbf16, #tpu.memory_space<vmem>>, vector<16x16xbf16>
    %cst_83 = arith.constant dense<0.000000e+00> : vector<16x16xf32>
    %96 = tpu.matmul %94, %95, %cst_83 {dimension_numbers = #tpu.dot_dimension_numbers<[1], [0], [0], [1], [0, 0, 1, 1], [], []>} : vector<16x16xbf16>, vector<16x16xbf16>, vector<16x16xf32> -> vector<16x16xf32>
    %97 = arith.addf %92, %96 : vector<16x16xf32>
    %c3_84 = arith.constant 3 : index
    %c32_85 = arith.constant 32 : index
    %98 = vector.load %arg7[%c3_84, %c32_85] : memref<20x48xf32, #tpu.memory_space<vmem>>, vector<16x16xf32>
    %99 = arith.truncf %98 : vector<16x16xf32> to vector<16x16xbf16>
    %c48_86 = arith.constant 48 : index
    %c48_87 = arith.constant 48 : index
    %100 = vector.load %arg3[%c48_86, %c48_87] : memref<160x128xbf16, #tpu.memory_space<vmem>>, vector<16x16xbf16>
    %cst_88 = arith.constant dense<0.000000e+00> : vector<16x16xf32>
    %101 = tpu.matmul %99, %100, %cst_88 {dimension_numbers = #tpu.dot_dimension_numbers<[1], [0], [0], [1], [0, 0, 1, 1], [], []>} : vector<16x16xbf16>, vector<16x16xbf16>, vector<16x16xf32> -> vector<16x16xf32>
    %102 = arith.addf %97, %101 : vector<16x16xf32>
    %c4_89 = arith.constant 4 : index
    %c32_90 = arith.constant 32 : index
    %103 = vector.load %arg7[%c4_89, %c32_90] : memref<20x48xf32, #tpu.memory_space<vmem>>, vector<16x16xf32>
    %104 = arith.truncf %103 : vector<16x16xf32> to vector<16x16xbf16>
    %c64_91 = arith.constant 64 : index
    %c48_92 = arith.constant 48 : index
    %105 = vector.load %arg3[%c64_91, %c48_92] : memref<160x128xbf16, #tpu.memory_space<vmem>>, vector<16x16xbf16>
    %cst_93 = arith.constant dense<0.000000e+00> : vector<16x16xf32>
    %106 = tpu.matmul %104, %105, %cst_93 {dimension_numbers = #tpu.dot_dimension_numbers<[1], [0], [0], [1], [0, 0, 1, 1], [], []>} : vector<16x16xbf16>, vector<16x16xbf16>, vector<16x16xf32> -> vector<16x16xf32>
    %107 = arith.addf %102, %106 : vector<16x16xf32>
    %c0_94 = arith.constant 0 : index
    %c48_95 = arith.constant 48 : index
    %108 = vector.load %arg5[%c0_94, %c48_95] : memref<1x357xf32, #tpu.memory_space<vmem>>, vector<1x16xf32>
    %109 = vector.broadcast %108 : vector<1x16xf32> to vector<16x16xf32>
    %110 = arith.addf %107, %109 : vector<16x16xf32>
    %111 = vector.broadcast %3 : vector<16x1xf32> to vector<16x16xf32>
    %112 = arith.mulf %110, %111 : vector<16x16xf32>
    %cst_96 = arith.constant 0.000000e+00 : f32
    %113 = vector.broadcast %cst_96 : f32 to vector<16x16xf32>
    %114 = arith.maximumf %112, %113 : vector<16x16xf32>
    %115 = arith.truncf %1 : vector<16x32xf32> to vector<16x32xbf16>
    %c0_97 = arith.constant 0 : index
    %c64_98 = arith.constant 64 : index
    %116 = vector.load %arg3[%c0_97, %c64_98] : memref<160x128xbf16, #tpu.memory_space<vmem>>, vector<32x32xbf16>
    %cst_99 = arith.constant dense<0.000000e+00> : vector<16x32xf32>
    %117 = tpu.matmul %115, %116, %cst_99 {dimension_numbers = #tpu.dot_dimension_numbers<[1], [0], [0], [1], [0, 0, 1, 1], [], []>} : vector<16x32xbf16>, vector<32x32xbf16>, vector<16x32xf32> -> vector<16x32xf32>
    %118 = arith.truncf %51 : vector<16x16xf32> to vector<16x16xbf16>
    %c32_100 = arith.constant 32 : index
    %c64_101 = arith.constant 64 : index
    %119 = vector.load %arg3[%c32_100, %c64_101] : memref<160x128xbf16, #tpu.memory_space<vmem>>, vector<16x32xbf16>
    %cst_102 = arith.constant dense<0.000000e+00> : vector<16x32xf32>
    %120 = tpu.matmul %118, %119, %cst_102 {dimension_numbers = #tpu.dot_dimension_numbers<[1], [0], [0], [1], [0, 0, 1, 1], [], []>} : vector<16x16xbf16>, vector<16x32xbf16>, vector<16x32xf32> -> vector<16x32xf32>
    %121 = arith.addf %117, %120 : vector<16x32xf32>
    %122 = arith.truncf %114 : vector<16x16xf32> to vector<16x16xbf16>
    %c48_103 = arith.constant 48 : index
    %c64_104 = arith.constant 64 : index
    %123 = vector.load %arg3[%c48_103, %c64_104] : memref<160x128xbf16, #tpu.memory_space<vmem>>, vector<16x32xbf16>
    %cst_105 = arith.constant dense<0.000000e+00> : vector<16x32xf32>
    %124 = tpu.matmul %122, %123, %cst_105 {dimension_numbers = #tpu.dot_dimension_numbers<[1], [0], [0], [1], [0, 0, 1, 1], [], []>} : vector<16x16xbf16>, vector<16x32xbf16>, vector<16x32xf32> -> vector<16x32xf32>
    %125 = arith.addf %121, %124 : vector<16x32xf32>
    %c0_106 = arith.constant 0 : index
    %c64_107 = arith.constant 64 : index
    %126 = vector.load %arg5[%c0_106, %c64_107] : memref<1x357xf32, #tpu.memory_space<vmem>>, vector<1x32xf32>
    %127 = vector.broadcast %126 : vector<1x32xf32> to vector<16x32xf32>
    %128 = arith.addf %125, %127 : vector<16x32xf32>
    %129 = vector.broadcast %3 : vector<16x1xf32> to vector<16x32xf32>
    %130 = arith.mulf %128, %129 : vector<16x32xf32>
    %cst_108 = arith.constant 0.000000e+00 : f32
    %131 = vector.broadcast %cst_108 : f32 to vector<16x32xf32>
    %132 = arith.maximumf %130, %131 : vector<16x32xf32>
    %c0_109 = arith.constant 0 : index
    %c165 = arith.constant 165 : index
    %133 = vector.load %arg5[%c0_109, %c165] : memref<1x357xf32, #tpu.memory_space<vmem>>, vector<1x32xf32>
    %c0_110 = arith.constant 0 : index
    %c197 = arith.constant 197 : index
    %134 = vector.load %arg5[%c0_110, %c197] : memref<1x357xf32, #tpu.memory_space<vmem>>, vector<1x32xf32>
    %cst_111 = arith.constant dense<0.000000e+00> : vector<16xf32>
    %135 = vector.multi_reduction <add>, %132, %cst_111 [1] : vector<16x32xf32> to vector<16xf32>
    %136 = vector.shape_cast %135 : vector<16xf32> to vector<16x1xf32>
    %cst_112 = arith.constant 3.200000e+01 : f32
    %137 = vector.broadcast %cst_112 : f32 to vector<16x1xf32>
    %138 = arith.divf %136, %137 : vector<16x1xf32>
    %139 = vector.broadcast %138 : vector<16x1xf32> to vector<16x32xf32>
    %140 = arith.subf %132, %139 : vector<16x32xf32>
    %141 = arith.mulf %140, %140 : vector<16x32xf32>
    %cst_113 = arith.constant dense<0.000000e+00> : vector<16xf32>
    %142 = vector.multi_reduction <add>, %141, %cst_113 [1] : vector<16x32xf32> to vector<16xf32>
    %143 = vector.shape_cast %142 : vector<16xf32> to vector<16x1xf32>
    %cst_114 = arith.constant 3.200000e+01 : f32
    %144 = vector.broadcast %cst_114 : f32 to vector<16x1xf32>
    %145 = arith.divf %143, %144 : vector<16x1xf32>
    %146 = vector.broadcast %138 : vector<16x1xf32> to vector<16x32xf32>
    %147 = arith.subf %132, %146 : vector<16x32xf32>
    %cst_115 = arith.constant 9.99999974E-6 : f32
    %148 = vector.broadcast %cst_115 : f32 to vector<16x1xf32>
    %149 = arith.addf %145, %148 : vector<16x1xf32>
    %150 = math.rsqrt %149 : vector<16x1xf32>
    %151 = vector.broadcast %150 : vector<16x1xf32> to vector<16x32xf32>
    %152 = arith.mulf %147, %151 : vector<16x32xf32>
    %153 = vector.broadcast %133 : vector<1x32xf32> to vector<16x32xf32>
    %154 = arith.mulf %152, %153 : vector<16x32xf32>
    %155 = vector.broadcast %134 : vector<1x32xf32> to vector<16x32xf32>
    %156 = arith.addf %154, %155 : vector<16x32xf32>
    %157 = vector.extract_strided_slice %156 {offsets = [0, 0], sizes = [15, 32], strides = [1, 1]} : vector<16x32xf32> to vector<15x32xf32>
    %158 = arith.truncf %157 : vector<15x32xf32> to vector<15x32xbf16>
    %c0_116 = arith.constant 0 : index
    %c96_117 = arith.constant 96 : index
    %159 = vector.load %arg3[%c0_116, %c96_117] : memref<160x128xbf16, #tpu.memory_space<vmem>>, vector<32x16xbf16>
    %cst_118 = arith.constant dense<0.000000e+00> : vector<15x16xf32>
    %160 = tpu.matmul %158, %159, %cst_118 {dimension_numbers = #tpu.dot_dimension_numbers<[1], [0], [0], [1], [0, 0, 1, 1], [], []>} : vector<15x32xbf16>, vector<32x16xbf16>, vector<15x16xf32> -> vector<15x16xf32>
    %161 = vector.extract_strided_slice %156 {offsets = [1, 0], sizes = [15, 32], strides = [1, 1]} : vector<16x32xf32> to vector<15x32xf32>
    %162 = arith.truncf %161 : vector<15x32xf32> to vector<15x32xbf16>
    %c32_119 = arith.constant 32 : index
    %c96_120 = arith.constant 96 : index
    %163 = vector.load %arg3[%c32_119, %c96_120] : memref<160x128xbf16, #tpu.memory_space<vmem>>, vector<32x16xbf16>
    %cst_121 = arith.constant dense<0.000000e+00> : vector<15x16xf32>
    %164 = tpu.matmul %162, %163, %cst_121 {dimension_numbers = #tpu.dot_dimension_numbers<[1], [0], [0], [1], [0, 0, 1, 1], [], []>} : vector<15x32xbf16>, vector<32x16xbf16>, vector<15x16xf32> -> vector<15x16xf32>
    %165 = arith.addf %160, %164 : vector<15x16xf32>
    %c0_122 = arith.constant 0 : index
    %c96_123 = arith.constant 96 : index
    %166 = vector.load %arg5[%c0_122, %c96_123] : memref<1x357xf32, #tpu.memory_space<vmem>>, vector<1x16xf32>
    %167 = vector.broadcast %166 : vector<1x16xf32> to vector<15x16xf32>
    %168 = arith.addf %165, %167 : vector<15x16xf32>
    %cst_124 = arith.constant 0.000000e+00 : f32
    %169 = vector.broadcast %cst_124 : f32 to vector<15x16xf32>
    %170 = arith.maximumf %168, %169 : vector<15x16xf32>
    %cst_125 = arith.constant dense<0xFF800000> : vector<16xf32>
    %171 = vector.multi_reduction <maximumf>, %170, %cst_125 [0] : vector<15x16xf32> to vector<16xf32>
    %172 = vector.shape_cast %171 : vector<16xf32> to vector<1x16xf32>
    %c0_126 = arith.constant 0 : index
    %c0_127 = arith.constant 0 : index
    %173 = vector.load %arg8[%c0_126, %c0_127] : memref<1x32xf32, #tpu.memory_space<vmem>>, vector<1x16xf32>
    tpu.vector_store %arg8[%c0_126, %c0_127], %172 {strides = array<i32>} : memref<1x32xf32, #tpu.memory_space<vmem>>, vector<1x16xf32>,
    %174 = vector.extract_strided_slice %156 {offsets = [0, 0], sizes = [14, 32], strides = [1, 1]} : vector<16x32xf32> to vector<14x32xf32>
    %175 = arith.truncf %174 : vector<14x32xf32> to vector<14x32xbf16>
    %c0_128 = arith.constant 0 : index
    %c112 = arith.constant 112 : index
    %176 = vector.load %arg3[%c0_128, %c112] : memref<160x128xbf16, #tpu.memory_space<vmem>>, vector<32x16xbf16>
    %cst_129 = arith.constant dense<0.000000e+00> : vector<14x16xf32>
    %177 = tpu.matmul %175, %176, %cst_129 {dimension_numbers = #tpu.dot_dimension_numbers<[1], [0], [0], [1], [0, 0, 1, 1], [], []>} : vector<14x32xbf16>, vector<32x16xbf16>, vector<14x16xf32> -> vector<14x16xf32>
    %178 = vector.extract_strided_slice %156 {offsets = [1, 0], sizes = [14, 32], strides = [1, 1]} : vector<16x32xf32> to vector<14x32xf32>
    %179 = arith.truncf %178 : vector<14x32xf32> to vector<14x32xbf16>
    %c32_130 = arith.constant 32 : index
    %c112_131 = arith.constant 112 : index
    %180 = vector.load %arg3[%c32_130, %c112_131] : memref<160x128xbf16, #tpu.memory_space<vmem>>, vector<32x16xbf16>
    %cst_132 = arith.constant dense<0.000000e+00> : vector<14x16xf32>
    %181 = tpu.matmul %179, %180, %cst_132 {dimension_numbers = #tpu.dot_dimension_numbers<[1], [0], [0], [1], [0, 0, 1, 1], [], []>} : vector<14x32xbf16>, vector<32x16xbf16>, vector<14x16xf32> -> vector<14x16xf32>
    %182 = arith.addf %177, %181 : vector<14x16xf32>
    %183 = vector.extract_strided_slice %156 {offsets = [2, 0], sizes = [14, 32], strides = [1, 1]} : vector<16x32xf32> to vector<14x32xf32>
    %184 = arith.truncf %183 : vector<14x32xf32> to vector<14x32xbf16>
    %c64_133 = arith.constant 64 : index
    %c112_134 = arith.constant 112 : index
    %185 = vector.load %arg3[%c64_133, %c112_134] : memref<160x128xbf16, #tpu.memory_space<vmem>>, vector<32x16xbf16>
    %cst_135 = arith.constant dense<0.000000e+00> : vector<14x16xf32>
    %186 = tpu.matmul %184, %185, %cst_135 {dimension_numbers = #tpu.dot_dimension_numbers<[1], [0], [0], [1], [0, 0, 1, 1], [], []>} : vector<14x32xbf16>, vector<32x16xbf16>, vector<14x16xf32> -> vector<14x16xf32>
    %187 = arith.addf %182, %186 : vector<14x16xf32>
    %c0_136 = arith.constant 0 : index
    %c112_137 = arith.constant 112 : index
    %188 = vector.load %arg5[%c0_136, %c112_137] : memref<1x357xf32, #tpu.memory_space<vmem>>, vector<1x16xf32>
    %189 = vector.broadcast %188 : vector<1x16xf32> to vector<14x16xf32>
    %190 = arith.addf %187, %189 : vector<14x16xf32>
    %cst_138 = arith.constant 0.000000e+00 : f32
    %191 = vector.broadcast %cst_138 : f32 to vector<14x16xf32>
    %192 = arith.maximumf %190, %191 : vector<14x16xf32>
    %cst_139 = arith.constant dense<0xFF800000> : vector<16xf32>
    %193 = vector.multi_reduction <maximumf>, %192, %cst_139 [0] : vector<14x16xf32> to vector<16xf32>
    %194 = vector.shape_cast %193 : vector<16xf32> to vector<1x16xf32>
    %c0_140 = arith.constant 0 : index
    %c16_141 = arith.constant 16 : index
    %195 = vector.load %arg8[%c0_140, %c16_141] : memref<1x32xf32, #tpu.memory_space<vmem>>, vector<1x16xf32>
    tpu.vector_store %arg8[%c0_140, %c16_141], %194 {strides = array<i32>} : memref<1x32xf32, #tpu.memory_space<vmem>>, vector<1x16xf32>,
    %c0_142 = arith.constant 0 : index
    %c0_143 = arith.constant 0 : index
    %196 = vector.load %arg8[%c0_142, %c0_143] : memref<1x32xf32, #tpu.memory_space<vmem>>, vector<1x32xf32>
    %c0_144 = arith.constant 0 : index
    %c229 = arith.constant 229 : index
    %197 = vector.load %arg5[%c0_144, %c229] : memref<1x357xf32, #tpu.memory_space<vmem>>, vector<1x32xf32>
    %c0_145 = arith.constant 0 : index
    %c261 = arith.constant 261 : index
    %198 = vector.load %arg5[%c0_145, %c261] : memref<1x357xf32, #tpu.memory_space<vmem>>, vector<1x32xf32>
    %cst_146 = arith.constant dense<0.000000e+00> : vector<1xf32>
    %199 = vector.multi_reduction <add>, %196, %cst_146 [1] : vector<1x32xf32> to vector<1xf32>
    %200 = vector.shape_cast %199 : vector<1xf32> to vector<1x1xf32>
    %cst_147 = arith.constant 3.200000e+01 : f32
    %201 = vector.broadcast %cst_147 : f32 to vector<1x1xf32>
    %202 = arith.divf %200, %201 : vector<1x1xf32>
    %203 = vector.broadcast %202 : vector<1x1xf32> to vector<1x32xf32>
    %204 = arith.subf %196, %203 : vector<1x32xf32>
    %205 = arith.mulf %204, %204 : vector<1x32xf32>
    %cst_148 = arith.constant dense<0.000000e+00> : vector<1xf32>
    %206 = vector.multi_reduction <add>, %205, %cst_148 [1] : vector<1x32xf32> to vector<1xf32>
    %207 = vector.shape_cast %206 : vector<1xf32> to vector<1x1xf32>
    %cst_149 = arith.constant 3.200000e+01 : f32
    %208 = vector.broadcast %cst_149 : f32 to vector<1x1xf32>
    %209 = arith.divf %207, %208 : vector<1x1xf32>
    %210 = vector.broadcast %202 : vector<1x1xf32> to vector<1x32xf32>
    %211 = arith.subf %196, %210 : vector<1x32xf32>
    %cst_150 = arith.constant 9.99999974E-6 : f32
    %212 = vector.broadcast %cst_150 : f32 to vector<1x1xf32>
    %213 = arith.addf %209, %212 : vector<1x1xf32>
    %214 = math.rsqrt %213 : vector<1x1xf32>
    %215 = vector.broadcast %214 : vector<1x1xf32> to vector<1x32xf32>
    %216 = arith.mulf %211, %215 : vector<1x32xf32>
    %217 = arith.mulf %216, %197 : vector<1x32xf32>
    %218 = arith.addf %217, %198 : vector<1x32xf32>
    %c0_151 = arith.constant 0 : index
    %c0_152 = arith.constant 0 : index
    %219 = vector.load %arg4[%c0_151, %c0_152] : memref<32x37xf32, #tpu.memory_space<vmem>>, vector<32x32xf32>
    %cst_153 = arith.constant dense<0.000000e+00> : vector<1x32xf32>
    %220 = tpu.matmul %218, %219, %cst_153 {dimension_numbers = #tpu.dot_dimension_numbers<[1], [0], [0], [1], [0, 0, 1, 1], [], []>} : vector<1x32xf32>, vector<32x32xf32>, vector<1x32xf32> -> vector<1x32xf32>
    %c0_154 = arith.constant 0 : index
    %c128_155 = arith.constant 128 : index
    %221 = vector.load %arg5[%c0_154, %c128_155] : memref<1x357xf32, #tpu.memory_space<vmem>>, vector<1x32xf32>
    %222 = arith.addf %220, %221 : vector<1x32xf32>
    %c0_156 = arith.constant 0 : index
    %c293 = arith.constant 293 : index
    %223 = vector.load %arg5[%c0_156, %c293] : memref<1x357xf32, #tpu.memory_space<vmem>>, vector<1x32xf32>
    %c0_157 = arith.constant 0 : index
    %c325 = arith.constant 325 : index
    %224 = vector.load %arg5[%c0_157, %c325] : memref<1x357xf32, #tpu.memory_space<vmem>>, vector<1x32xf32>
    %cst_158 = arith.constant dense<0.000000e+00> : vector<1xf32>
    %225 = vector.multi_reduction <add>, %222, %cst_158 [1] : vector<1x32xf32> to vector<1xf32>
    %226 = vector.shape_cast %225 : vector<1xf32> to vector<1x1xf32>
    %cst_159 = arith.constant 3.200000e+01 : f32
    %227 = vector.broadcast %cst_159 : f32 to vector<1x1xf32>
    %228 = arith.divf %226, %227 : vector<1x1xf32>
    %229 = vector.broadcast %228 : vector<1x1xf32> to vector<1x32xf32>
    %230 = arith.subf %222, %229 : vector<1x32xf32>
    %231 = arith.mulf %230, %230 : vector<1x32xf32>
    %cst_160 = arith.constant dense<0.000000e+00> : vector<1xf32>
    %232 = vector.multi_reduction <add>, %231, %cst_160 [1] : vector<1x32xf32> to vector<1xf32>
    %233 = vector.shape_cast %232 : vector<1xf32> to vector<1x1xf32>
    %cst_161 = arith.constant 3.200000e+01 : f32
    %234 = vector.broadcast %cst_161 : f32 to vector<1x1xf32>
    %235 = arith.divf %233, %234 : vector<1x1xf32>
    %236 = vector.broadcast %228 : vector<1x1xf32> to vector<1x32xf32>
    %237 = arith.subf %222, %236 : vector<1x32xf32>
    %cst_162 = arith.constant 9.99999974E-6 : f32
    %238 = vector.broadcast %cst_162 : f32 to vector<1x1xf32>
    %239 = arith.addf %235, %238 : vector<1x1xf32>
    %240 = math.rsqrt %239 : vector<1x1xf32>
    %241 = vector.broadcast %240 : vector<1x1xf32> to vector<1x32xf32>
    %242 = arith.mulf %237, %241 : vector<1x32xf32>
    %243 = arith.mulf %242, %223 : vector<1x32xf32>
    %244 = arith.addf %243, %224 : vector<1x32xf32>
    %c0_163 = arith.constant 0 : index
    %c32_164 = arith.constant 32 : index
    %245 = vector.load %arg4[%c0_163, %c32_164] : memref<32x37xf32, #tpu.memory_space<vmem>>, vector<32x5xf32>
    %cst_165 = arith.constant dense<0.000000e+00> : vector<1x5xf32>
    %246 = tpu.matmul %244, %245, %cst_165 {dimension_numbers = #tpu.dot_dimension_numbers<[1], [0], [0], [1], [0, 0, 1, 1], [], []>} : vector<1x32xf32>, vector<32x5xf32>, vector<1x5xf32> -> vector<1x5xf32>
    %c0_166 = arith.constant 0 : index
    %c160 = arith.constant 160 : index
    %247 = vector.load %arg5[%c0_166, %c160] : memref<1x357xf32, #tpu.memory_space<vmem>>, vector<1x5xf32>
    %248 = arith.addf %246, %247 : vector<1x5xf32>
    %c0_167 = arith.constant 0 : index
    %c0_168 = arith.constant 0 : index
    %c0_169 = arith.constant 0 : index
    %249 = vector.load %arg6[%c0_167, %c0_168, %c0_169] : memref<1x1x5xf32, #tpu.memory_space<vmem>>, vector<1x1x5xf32>
    %250 = vector.shape_cast %249 : vector<1x1x5xf32> to vector<1x5xf32>
    %251 = vector.shape_cast %248 : vector<1x5xf32> to vector<1x1x5xf32>
    tpu.vector_store %arg6[%c0_167, %c0_168, %c0_169], %251 {strides = array<i32>} : memref<1x1x5xf32, #tpu.memory_space<vmem>>, vector<1x1x5xf32>,
    return
  }
  func.func @transform_0(%arg0: i32) -> (i32, i32, i32) {
    %c0_i32 = arith.constant 0 : i32
    %c0_i32_0 = arith.constant 0 : i32
    %c0_i32_1 = arith.constant 0 : i32
    return %arg0, %c0_i32, %c0_i32_0 : i32, i32, i32
  }
  func.func @transform_1(%arg0: i32) -> (i32, i32, i32) {
    %c0_i32 = arith.constant 0 : i32
    %c0_i32_0 = arith.constant 0 : i32
    %c0_i32_1 = arith.constant 0 : i32
    return %arg0, %c0_i32, %c0_i32_0 : i32, i32, i32
  }
  func.func @transform_2(%arg0: i32) -> (i32, i32) {
    %c0_i32 = arith.constant 0 : i32
    %c0_i32_0 = arith.constant 0 : i32
    %c0_i32_1 = arith.constant 0 : i32
    return %c0_i32, %c0_i32_0 : i32, i32
  }
  func.func @transform_3(%arg0: i32) -> (i32, i32) {
    %c0_i32 = arith.constant 0 : i32
    %c0_i32_0 = arith.constant 0 : i32
    %c0_i32_1 = arith.constant 0 : i32
    return %c0_i32, %c0_i32_0 : i32, i32
  }
  func.func @transform_4(%arg0: i32) -> (i32, i32) {
    %c0_i32 = arith.constant 0 : i32
    %c0_i32_0 = arith.constant 0 : i32
    %c0_i32_1 = arith.constant 0 : i32
    return %c0_i32, %c0_i32_0 : i32, i32
  }
  func.func @transform_5(%arg0: i32) -> (i32, i32, i32) {
    %c0_i32 = arith.constant 0 : i32
    %c0_i32_0 = arith.constant 0 : i32
    %c0_i32_1 = arith.constant 0 : i32
    return %arg0, %c0_i32, %c0_i32_0 : i32, i32, i32
  }
}

</mosaic_0001>

<bundles_post_ra>
// kernel: forward.1
= control target key start
LH: loop header
LB: loop body
LE: loop exit
PB: predicated region body
PF: predicated region fallthrough
CT: control target
= control target key end

     0   :  { %10 = vsyncpa [#allocation5], 0  ;;  %s3359_s0 = inlined_call_operand.vmem [shape: f32[2,16,32], index: 0, kind: input, shape index: {}]   ;;  %s3360_s1 = inlined_call_operand.vmem [shape: f32[2,16,1], index: 1, kind: input, shape index: {}]   ;;  %s3361_s2 = inlined_call_operand.hbm [shape: bf16[160,128], index: 2, kind: input, shape index: {}]   ;;  %s3362_s3 = inlined_call_operand.hbm [shape: f32[32,37], index: 3, kind: input, shape index: {}]   ;;  %s3363_s4 = inlined_call_operand.vmem [shape: f32[1,357], index: 4, kind: input, shape index: {}]   ;;  %s3364_s5 = inlined_call_operand.hbm [shape: f32[2,1,5], index: 5, kind: output, shape index: {}]  }
   0x1   :  { %11 = vsyncpa [#allocation8], 0 }
   0x2   :  { %12 = vsyncpa [#allocation6], 0 }
   0x3   :  { %14 = vsyncpa [#allocation6 + $0x1], 0  ;;  %s2929_s18 = smov 0   ;;  %s2931_s19 = smov 0  }
   0x4   :  { %s2933_s20 = smov 0   ;;  %s2935_s21 = smov 0  }
   0x5 LB: > { %s2950_s22 = sadd.s32 4294967295, %s2876_s21   ;;  %s2265_s23 = sadd.s32 4294967294, %s2876_s21   ;;  %s2876_s21 = sphi %s2935_s21, %s3382_s21   ;;  %s2872_s20 = sphi %s2933_s20, %s3381_s20   ;;  %s2868_s19 = sphi %s2931_s19, %s3380_s19   ;;  %s2864_s18 = sphi %s2929_s18, %s3379_s18  }
   0x6   : > { %s2954_s24 = sadd.s32 1, %s2876_s21   ;;  %s142_s25 = sadd.s32 1, %s2872_s20 }
   0x7   : > { %s139_s26 = ssub.s32 %s2876_s21, %s2954_s24  ;;  %p152_p0 = scmp.ne.s32.totalorder %s2872_s20, %s2868_s19 }
   0x8   : > { %p140_p1 = scmp.eq.s32.totalorder %s139_s26, 0  ;;  %p153_p2 = scmp.eq.s32.totalorder %s2950_s22, 1 }
   0x9   : > { %p158_p3 = scmp.ne.s32.totalorder %s2868_s19, %s2864_s18  ;;  %p159_p4 = scmp.eq.s32.totalorder %s2265_s23, 1 }
   0xa   : > { %s2965_s27 = scalar_select %p140_p1, %s2872_s20, %s142_s25  }
   0xb   : > { %p2967_p5 = por %p153_p2, %p152_p0  ;;  %p2971_p6 = por %p159_p4, %p158_p3 }
   0xc   : > { %p2266_p7 = scmp.ge.s32.totalorder %s2876_s21, 1  ;;  %p166_p8 = scmp.lt.s32.totalorder %s2876_s21, 3 }
   0xd   : > { %s3368_s28 = scalar_select %p2967_p5, 1, 0 }
   0xe   : > { %s3369_s29 = scalar_select %p2971_p6, 1, 0 }
   0xf   : > { %p3365_p9 = scmp.eq.s32.totalorder %s2950_s22, 0  ;;  %p2978_p10 = pnand %p2266_p7, %p166_p8 }
  0x10   : > { %s2878_s6 = smov [#allocation4]   ;;  %s2879_s9 = smov [#allocation7]  }
  0x11   : > { %s3370_s30 = scalar_select %p2978_p10, 1, 0 }
  0x12   : > { %s178_s7 = sshll.u32 %s2878_s6, 4  ;;  %p2632_p11 = pneg %p2978_p10  ;;  %s179_s7 = int_to_ptr.vmem [resolvable:$true] %s178_s7 }
  0x13   : > { %s191_s10 = sshll.u32 %s2879_s9, 4  ;;  %s2750_s13 = scalar_lea.hbm %s3361_s2, 1280  ;;  %s2990_s10 = int_to_ptr.vmem [resolvable:$true] %s191_s10 }
  0x14   : > { %p2986_p12 = pnand %p3365_p9, %p2632_p11  ;;  %p2751_p13 = scmp.ne.s32.totalorder %s3361_s2, %s2750_s13 }
  0x15   : > { %p2757_p3 = scmp.lt.u32.totalorder %s2750_s13, %s3361_s2 }
  0x16   : > { %p2752_p0 = pneg %p2986_p12 }
  0x18   : > { %p2753_p1 = pnand %p2752_p0, %p2751_p13 }
  0x1a   : > { %p2754_p2 = pneg %p2753_p1 }
  0x1c   : > { %p2759_p4 = pnand %p2757_p3, %p2754_p2 }
  0x1e   : > { %2762 = shalt.err (!%p2759_p4)
}
  0x1f   : > { %s2763_s23 = scalar_lea.vmem %s179_s7, 1280  ;;  %p2771_p9 = scmp.lt.s32.totalorder %s179_s7, %s179_s7 }
  0x20   : > { %p2764_p7 = scmp.ne.s32.totalorder %s179_s7, %s2763_s23  ;;  %p2772_p6 = scmp.lt.s32.totalorder %s2763_s23, %s2763_s23 }
  0x22   : > { %p2766_p8 = pnand %p2764_p7, %p2752_p0  ;;  %p2773_p5 = por %p2772_p6, %p2771_p9 }
  0x24   : > { %p2767_p11 = pneg %p2766_p8 }
  0x26   : > { %p2774_p10 = pnand %p2773_p5, %p2767_p11 }
  0x28   : > { %2777 = shalt.err (!%p2774_p10)
}
  0x29   : > { %s2880_s25 = smov 64   ;;  %s2881_s26 = smov 4  }
  0x2a   : > { %2635 = dma.hbm_to_vmem [thread:$0]  (!%p2986_p12), %s3361_s2, 1280, %s179_s7, [#allocation5], %s2880_s25, %s2880_s25, %s2881_s26  }
  0x2b   : > { %s2778_s13 = scalar_lea.hbm %s3362_s3, 512 }
  0x2c   : > { %p2779_p13 = scmp.ne.s32.totalorder %s3362_s3, %s2778_s13  ;;  %p2785_p9 = scmp.lt.u32.totalorder %s2778_s13, %s3362_s3 }
  0x2e   : > { %p2781_p5 = pnand %p2779_p13, %p2752_p0 }
  0x30   : > { %p2782_p6 = pneg %p2781_p5 }
  0x32   : > { %p2787_p10 = pnand %p2785_p9, %p2782_p6 }
  0x34   : > { %2790 = shalt.err (!%p2787_p10)
}
  0x35   : > { %s2791_s7 = scalar_lea.vmem %s2990_s10, 512  ;;  %p2799_p4 = scmp.lt.s32.totalorder %s2990_s10, %s2990_s10 }
  0x36   : > { %p2792_p1 = scmp.ne.s32.totalorder %s2990_s10, %s2791_s7  ;;  %p2800_p7 = scmp.lt.s32.totalorder %s2791_s7, %s2791_s7 }
  0x38   : > { %p2794_p2 = pnand %p2792_p1, %p2752_p0  ;;  %p2801_p8 = por %p2800_p7, %p2799_p4 }
  0x3a   : > { %p2795_p3 = pneg %p2794_p2 }
  0x3c   : > { %p2802_p11 = pnand %p2801_p8, %p2795_p3 }
  0x3e   : > { %2805 = shalt.err (!%p2802_p11)
}
  0x3f   : > { %s2882_s23 = smov 128   ;;  %s2883_s25 = smov 8  }
  0x40   : > { %2638 = dma.hbm_to_vmem [thread:$0]  (!%p2986_p12), %s3362_s3, 512, %s2990_s10, [#allocation8], %s2882_s23, %s2882_s23, %s2883_s25  }
  0x41   : > { %p3372_p13 = scmp.ne.s32.totalorder %s3370_s30, 0 }
  0x42   : > { %p3373_p0 = scmp.eq.s32.totalorder (!%p3372_p13), %s2950_s22, 0 }
  0x43   : > { %226 = sbr.rel (%p3372_p13) target bundleno = 3285 (0xcd5), region = 40 }
  0x4a   : > { %2851 = dma.done.wait (%p3373_p0), [#allocation5], 1280   ;;  %p3374_p5 = pmov %p3373_p0 }
  0x4b   : > { %p3375_p6 = pmov %p3373_p0 }
  0x4c   : > { %2853 = vsyncadd (%p3374_p5), [#allocation5], 4294966016 }
  0x4d   : > { %2855 = dma.done.wait (%p3375_p6), [#allocation8], 512   ;;  %p3376_p9 = pmov %p3373_p0 }
  0x4e   : > { %p262_p10 = scmp.lt.s32.totalorder %s2950_s22, 1  ;;  %v2884_v0 = vmov 0.0   ;;  %vm277_vm0 = vcmask 386048   ;;  %vm2885_vm1 = vmmov 0   ;;  %v2886_v1 = vmov 0   ;;  %v2711_v2 = vld [vmem:[#allocation4 + $0x10] sm:$0xff]  }
  0x4f   : > { %2857 = vsyncadd (%p3376_p9), [#allocation8], 4294966784  ;;  %2416 = vmatprep.subr.bf16.mxu0 %v2884_v0  ;;  %2424 = vmatprep.subr.bf16.mxu1 %v2884_v0  ;;  %278 = vst.msk [vmem:[#allocation2] sm:$0x3] %vm277_vm0, %v2884_v0  ;;  %v2712_v3 = vld [vmem:[#allocation4] sm:$0xff]   ;;  %v2713_v4 = vld [vmem:[#allocation4 + $0x18] sm:$0xff]  }
  0x50   : > { %2420 = vmatprep.mubr.msk.bf16.mxu0 %vm2885_vm1, %v2884_v0  ;;  %2428 = vmatprep.mubr.msk.bf16.mxu1 %vm2885_vm1, %v2884_v0  ;;  %s263_s30 = scalar_select %p262_p10, %s2950_s22, 1  ;;  %279 = vst.msk [vmem:[#allocation2 + $0x12] sm:$0x3] %vm277_vm0, %v2884_v0  ;;  %vm280_vm2 = vcmask 261120   ;;  %v2714_v5 = vld [vmem:[#allocation4 + $0x8] sm:$0xff]   ;;  %v2715_v10 = vld [vmem:[#allocation4 + $0x20] sm:$0xff]  }
  0x51   : > { %2700 = vset.pattern.permute.xlu0 %v2886_v1  ;;  %2417 = vmatpush3.bf16.msra.mxu0 %v2711_v2  ;;  %v2716_v17 = vld [vmem:[#allocation4 + $0x28] sm:$0xff]   ;;  %v3093_v33 = vld [vmem:[%s3363_s4] ss:$0 sm:$0xff]  ;;  %s2887_s17 = smov 96   ;;  %s2888_s7 = smov 32   ;;  %vm505_vm3 = vcmask 392448  }
  0x52   : > { %s2342_s8 = sshll.u32 %s263_s30, 4  ;;  %2425 = vmatpush3.bf16.msra.mxu1 %v2712_v3  ;;  %2418 = vmatprep.subr.bf16.mxu0 %v2884_v0  ;;  %v2717_v34 = vld [vmem:[#allocation4 + $0x8] sm:$0xff]   ;;  %v2718_v47 = vld [vmem:[#allocation4] sm:$0xff]   ;;  %v2719_v58 = vld [vmem:[#allocation4 + $0x10] sm:$0xff]   ;;  %s2889_s23 = smov 112   ;;  %vm529_vm4 = vcmask 130048  }
  0x53   : > { %s266_s11 = scalar_lea.vmem %s3359_s0, %s2342_s8  ;;  %s271_s14 = scalar_lea.vmem %s3360_s1, %s2342_s8  ;;  %2426 = vmatprep.subr.bf16.mxu1 %v2884_v0  ;;  %v2720_v59 = vld [vmem:[#allocation4 + $0x10] sm:$0xff]   ;;  %v2721_v62 = vld [vmem:[#allocation4 + $0x18] sm:$0xff]   ;;  %v2722_v1 = vld [vmem:[#allocation4] sm:$0xff]   ;;  %vm1701_vm5 = vcmask 129024   ;;  %vm1710_vm6 = vcmask 122880   ;;  %vm1916_vm7 = vcmask 128000  }
  0x54   : > { %v3067_v6 = vld [vmem:[%s266_s11] sm:$0xff]  ;;  %v3069_v7 = vld [vmem:[%s266_s11 + $0x8] sm:$0xff]  ;;  %s2890_s25 = smov 80   ;;  %s2891_s26 = smov 64   ;;  %vm1929_vm8 = vcmask 254080   ;;  %vm1934_vm9 = vcmask 253952  }
  0x55   : > { %281 = vst.msk [vmem:[#allocation2 + $0x2] sm:$0xff] %vm280_vm2, %v3067_v6  ;;  %282 = vst.msk [vmem:[#allocation2 + $0xa] sm:$0xff] %vm280_vm2, %v3069_v7  ;;  %2419 = vmatpush3.bf16.msra.mxu0 %v2713_v4  ;;  %v275_v8 = vld [vmem:[%s271_s14] sm:$0xff]  ;;  %v276_v9 = vld [vmem:[%s271_s14 + $0x8] sm:$0xff]  ;;  %s2892_s8 = smov 91   ;;  %s2893_s10 = smov 16  }
  0x56   : > { %2427 = vmatpush3.bf16.msra.mxu1 %v2714_v5  ;;  %2432 = vmatprep.subr.bf16.mxu0 %v2884_v0  ;;  %v2723_v2 = vld [vmem:[#allocation4 + $0x20] sm:$0xff]   ;;  %v2724_v3 = vld [vmem:[#allocation4 + $0x28] sm:$0xff]   ;;  %v2725_v4 = vld [vmem:[#allocation4 + $0x30] sm:$0xff]   ;;  %s2894_s9 = smov 59   ;;  %s2895_s13 = smov 123   ;;  %vm1952_vm10 = vcmask 220160  }
  0x57   : > { %485 = vperm.xlu0 %2700, %v275_v8   ;;  %2440 = vmatprep.subr.bf16.mxu1 %v2884_v0  ;;  %v2726_v5 = vld [vmem:[#allocation4 + $0x40] sm:$0xff]   ;;  %v2727_v8 = vld [vmem:[#allocation4 + $0x38] sm:$0xff]   ;;  %s2897_s16 = smov 27   ;;  %vm2161_vm11 = vcmask 32768   ;;  %p3377_p1 = scmp.ne.s32.totalorder %s3368_s28, 0 }
  0x5b   : > { %490 = vperm.xlu0 %2700, %v276_v9   ;;  %v2728_v9 = vld [vmem:[#allocation4 + $0x48] sm:$0xff]  }
  0x5c   : > { %v290_v11 = vld [vmem:[#allocation2 + $0x2] sm:$0xff]  ;;  %v291_v12 = vld [vmem:[#allocation2 + $0xa] sm:$0xff] }
  0x5d   : > { %v283_v13 = vld [vmem:[#allocation2 + $0x1] sm:$0xff]  ;;  %v292_v14 = vpack.c.bf16 %v291_v12, %v290_v11  ;;  %v284_v15 = vld [vmem:[#allocation2 + $0x9] sm:$0xff] }
  0x5e   : > { %v285_v16 = vpack.c.bf16 %v284_v15, %v283_v13  ;;  %v409_v18 = vld [vmem:[#allocation2 + $0x3] sm:$0xff]  ;;  %v410_v19 = vld [vmem:[#allocation2 + $0xb] sm:$0xff] }
  0x5f   : > { %2421 = vmatmul.mubr.msk.bf16.vlgmr.msra.gmra.mrb[0].mxu0 %vm280_vm2, %v292_v14  ;;  %v411_v20 = vpack.c.bf16 %v410_v19, %v409_v18  ;;  %526 = vrot.lane.b32.xlu0 %v2717_v34, %s2887_s17 }
  0x60   : > { %2429 = vmatmul.mubr.msk.bf16.vlgmr.msra.gmra.mrb[0].mxu1 %vm280_vm2, %v285_v16  ;;  %2433 = vmatpush3.bf16.msra.mxu0 %v2715_v10 }
  0x61   : > { %2434 = vmatprep.subr.bf16.mxu0 %v2884_v0  ;;  %2436 = vmatprep.mubr.msk.bf16.mxu0 %vm2885_vm1, %v2884_v0 }
  0x62   : > { %2442 = vmatprep.mubr.msk.bf16.mxu1 %vm2885_vm1, %v2884_v0 }
  0x64   : > { %2435 = vmatpush3.bf16.msra.mxu0 %v2716_v17 }
  0x65   : > { %2446 = vmatprep.subr.bf16.mxu0 %v2884_v0 }
  0x67   : > { %2437 = vmatmul.mubr.msk.bf16.vlgmr.msra.gmra.mrb[4].mxu0 %vm280_vm2, %v411_v20 }
  0x68   : > { %2448 = vmatprep.mubr.msk.bf16.mxu0 %vm2885_vm1, %v2884_v0 }
  0xd6   : > { %v3088_v31 = vpop.permute.xlu0 %485 }
  0xda   : > { %v3099_v43 = vpop.permute.xlu0 %490 }
  0xde   : > { %v527_v48 = vpop.permute.xlu0 %526 }
  0xdf   : > { %2441 = vmatpush3.bf16.msra.mxu1 %v527_v48 }
  0xe0   : > { %2452 = vmatprep.subr.bf16.mxu1 %v2884_v0 }
 0x132   : > { %v346_v21 = vpop.f32.mrb[0].mxu0 }
 0x133   : > { %v402_v22 = vpop.f32.mrb[0].mxu1  ;;  %v2422_v23 = vpop.f32.mrb[1].mxu0 }
 0x134   : > { %v403_v24 = vadd.f32 %v402_v22, %v346_v21  ;;  %v2430_v25 = vpop.f32.mrb[1].mxu1  ;;  %v349_v26 = vpop.f32.mrb[2].mxu0 }
 0x135   : > { %v405_v27 = vpop.f32.mrb[2].mxu1  ;;  %v2423_v28 = vpop.f32.mrb[3].mxu0 }
 0x136   : > { %v406_v29 = vadd.f32 %v405_v27, %v349_v26  ;;  %v2431_v30 = vpop.f32.mrb[3].mxu1 }
 0x13a   : > { %v465_v32 = vpop.f32.mrb[4].mxu0 }
 0x13b   : > { %v472_v35 = vadd.f32 %v465_v32, %v403_v24  ;;  %v2438_v36 = vpop.f32.mrb[5].mxu0 }
 0x13c   : > { %v468_v37 = vpop.f32.mrb[6].mxu0 }
 0x13d   : > { %v481_v38 = vadd.f32 %v3093_v33, %v472_v35  ;;  %v473_v39 = vadd.f32 %v468_v37, %v406_v29  ;;  %v2439_v40 = vpop.f32.mrb[7].mxu0 }
 0x13f   : > { %v482_v41 = vadd.f32 %v3093_v33, %v473_v39  ;;  %v493_v42 = vmul.f32 %v3088_v31, %v481_v38 }
 0x141   : > { %v495_v44 = vmax.f32 %v493_v42, 0.0  ;;  %v494_v45 = vmul.f32 %v3099_v43, %v482_v41 }
 0x143   : > { %499 = vrot.lane.b32.xlu1 %v495_v44, %s2888_s7  ;;  %v496_v46 = vmax.f32 %v494_v45, 0.0 }
 0x147   : > { %501 = vrot.lane.b32.xlu1 %v496_v46, %s2888_s7 }
 0x14b   : > { %582 = vrot.lane.b32.xlu1 %v2718_v47, %s2887_s17 }
 0x1b5   : > { %v500_v49 = vpop.permute.xlu1 %499 }
 0x1b6   : > { %506 = vst.msk [vmem:[#allocation2 + $0x2] sm:$0xff] %vm505_vm3, %v500_v49 }
 0x1b9   : > { %v502_v50 = vpop.permute.xlu1 %501 }
 0x1ba   : > { %507 = vst.msk [vmem:[#allocation2 + $0xa] sm:$0xff] %vm505_vm3, %v502_v50 }
 0x1bd   : > { %v583_v51 = vpop.permute.xlu1 %582  ;;  %v513_v52 = vld [vmem:[#allocation2 + $0x2] sm:$0xff] }
 0x1be   : > { %2447 = vmatpush3.bf16.msra.mxu0 %v583_v51  ;;  %v508_v54 = vld [vmem:[#allocation2 + $0x1] sm:$0xff] }
 0x1bf   : > { %2458 = vmatprep.subr.bf16.mxu0 %v2884_v0  ;;  %v706_v21 = vld [vmem:[#allocation2] sm:$0xff] }
 0x1c1   : > { %v514_v53 = vld [vmem:[#allocation2 + $0xa] sm:$0xff] }
 0x1c2   : > { %v509_v55 = vld [vmem:[#allocation2 + $0x9] sm:$0xff]  ;;  %v3109_v56 = vpack.c.bf16 %v514_v53, %v513_v52 }
 0x1c3   : > { %v510_v57 = vpack.c.bf16 %v509_v55, %v508_v54  ;;  %v629_v60 = vld [vmem:[#allocation2 + $0x3] sm:$0xff]  ;;  %v630_v61 = vld [vmem:[#allocation2 + $0xb] sm:$0xff] }
 0x1c4   : > { %519 = vrot.lane.b32.xlu0 %v3109_v56, %s2887_s17  ;;  %v3115_v63 = vpack.c.bf16 %v630_v61, %v629_v60  ;;  %v707_v18 = vld [vmem:[#allocation2 + $0x8] sm:$0xff] }
 0x1c5   : > { %575 = vrot.lane.b32.xlu1 %v510_v57, %s2887_s17  ;;  %v708_v22 = vpack.c.bf16 %v707_v18, %v706_v21  ;;  %v962_v25 = vld [vmem:[#allocation2 + $0x4] sm:$0xff]  ;;  %v963_v26 = vld [vmem:[#allocation2 + $0xc] sm:$0xff] }
 0x1c6   : > { %v964_v29 = vpack.c.bf16 %v963_v26, %v962_v25 }
 0x1c8   : > { %725 = vrot.lane.b32.xlu0 %v2719_v58, %s2889_s23 }
 0x1c9   : > { %642 = vrot.lane.b32.xlu1 %v2720_v59, %s2887_s17 }
 0x1cc   : > { %727 = vrot.lane.b32.xlu0 %v2721_v62, %s2889_s23 }
 0x1cd   : > { %635 = vrot.lane.b32.xlu1 %v3115_v63, %s2887_s17 }
 0x1d0   : > { %780 = vrot.lane.b32.xlu0 %v2722_v1, %s2889_s23 }
 0x1d1   : > { %844 = vrot.lane.b32.xlu1 %v2723_v2, %s2889_s23 }
 0x1d4   : > { %782 = vrot.lane.b32.xlu0 %v2717_v34, %s2889_s23 }
 0x1d5   : > { %846 = vrot.lane.b32.xlu1 %v2724_v3, %s2889_s23 }
 0x1d8   : > { %910 = vrot.lane.b32.xlu0 %v2725_v4, %s2889_s23 }
 0x1d9   : > { %979 = vrot.lane.b32.xlu1 %v2726_v5, %s2889_s23 }
 0x1dc   : > { %912 = vrot.lane.b32.xlu0 %v2727_v8, %s2889_s23 }
 0x1dd   : > { %981 = vrot.lane.b32.xlu1 %v2728_v9, %s2889_s23 }
 0x1e0   : > { %1031 = vrot.lane.b32.xlu0 %v3093_v33, %s2889_s23 }
 0x236   : > { %v520_v10 = vpop.permute.xlu0 %519 }
 0x237   : > { %v576_v11 = vpop.permute.xlu1 %575  ;;  %2443 = vmatmul.mubr.msk.bf16.vlgmr.msra.gmra.mrb[4].mxu1 %vm529_vm4, %v520_v10 }
 0x238   : > { %2449 = vmatmul.mubr.msk.bf16.vlgmr.msra.gmra.mrb[8].mxu0 %vm529_vm4, %v576_v11  ;;  %2454 = vmatprep.mubr.msk.bf16.mxu1 %vm2885_vm1, %v2884_v0 }
 0x239   : > { %2462 = vmatprep.mubr.msk.bf16.mxu0 %vm2885_vm1, %v2884_v0 }
 0x23a   : > { %v726_v12 = vpop.permute.xlu0 %725 }
 0x23b   : > { %v643_v13 = vpop.permute.xlu1 %642  ;;  %2459 = vmatpush3.bf16.msra.mxu0 %v726_v12 }
 0x23c   : > { %2453 = vmatpush3.bf16.msra.mxu1 %v643_v13  ;;  %2460 = vmatprep.subr.bf16.mxu0 %v2884_v0 }
 0x23d   : > { %2466 = vmatprep.subr.bf16.mxu1 %v2884_v0 }
 0x23e   : > { %v728_v14 = vpop.permute.xlu0 %727 }
 0x23f   : > { %v636_v15 = vpop.permute.xlu1 %635  ;;  %2461 = vmatpush3.bf16.msra.mxu0 %v728_v14 }
 0x240   : > { %2455 = vmatmul.mubr.msk.bf16.vlgmr.msra.gmra.mrb[8].mxu1 %vm529_vm4, %v636_v15  ;;  %2474 = vmatprep.subr.bf16.mxu0 %v2884_v0 }
 0x241   : > { %2470 = vmatprep.mubr.msk.bf16.mxu1 %vm2885_vm1, %v2884_v0 }
 0x242   : > { %v781_v16 = vpop.permute.xlu0 %780  ;;  %2463 = vmatmul.mubr.msk.bf16.vlgmr.msra.gmra.mrb[12].mxu0 %vm280_vm2, %v510_v57 }
 0x243   : > { %v845_v17 = vpop.permute.xlu1 %844  ;;  %2467 = vmatpush3.bf16.msra.mxu1 %v781_v16  ;;  %2478 = vmatprep.mubr.msk.bf16.mxu0 %vm2885_vm1, %v2884_v0 }
 0x244   : > { %2475 = vmatpush3.bf16.msra.mxu0 %v845_v17  ;;  %2468 = vmatprep.subr.bf16.mxu1 %v2884_v0 }
 0x245   : > { %2476 = vmatprep.subr.bf16.mxu0 %v2884_v0 }
 0x246   : > { %v783_v19 = vpop.permute.xlu0 %782 }
 0x247   : > { %v847_v20 = vpop.permute.xlu1 %846  ;;  %2469 = vmatpush3.bf16.msra.mxu1 %v783_v19 }
 0x248   : > { %2477 = vmatpush3.bf16.msra.mxu0 %v847_v20  ;;  %2482 = vmatprep.subr.bf16.mxu1 %v2884_v0 }
 0x249   : > { %2490 = vmatprep.subr.bf16.mxu0 %v2884_v0 }
 0x24a   : > { %v911_v23 = vpop.permute.xlu0 %910  ;;  %2471 = vmatmul.mubr.msk.bf16.vlgmr.msra.gmra.mrb[12].mxu1 %vm280_vm2, %v708_v22 }
 0x24b   : > { %2479 = vmatmul.mubr.msk.bf16.vlgmr.msra.gmra.mrb[16].mxu0 %vm280_vm2, %v3109_v56  ;;  %v980_v24 = vpop.permute.xlu1 %979  ;;  %2483 = vmatpush3.bf16.msra.mxu1 %v911_v23  ;;  %v3164_v23 = vld [vmem:[#allocation4 + $0x8] sm:$0xff]  }
 0x24c   : > { %2491 = vmatpush3.bf16.msra.mxu0 %v980_v24  ;;  %2484 = vmatprep.subr.bf16.mxu1 %v2884_v0  ;;  %v2730_v24 = vld [vmem:[#allocation4] sm:$0xff]  }
 0x24d   : > { %2492 = vmatprep.subr.bf16.mxu0 %v2884_v0  ;;  %2486 = vmatprep.mubr.msk.bf16.mxu1 %vm2885_vm1, %v2884_v0 }
 0x24e   : > { %2494 = vmatprep.mubr.msk.bf16.mxu0 %vm2885_vm1, %v2884_v0  ;;  %v913_v27 = vpop.permute.xlu0 %912 }
 0x24f   : > { %v982_v28 = vpop.permute.xlu1 %981  ;;  %2485 = vmatpush3.bf16.msra.mxu1 %v913_v27 }
 0x250   : > { %2493 = vmatpush3.bf16.msra.mxu0 %v982_v28  ;;  %2498 = vmatprep.subr.bf16.mxu1 %v2884_v0 }
 0x251   : > { %2504 = vmatprep.subr.bf16.mxu0 %v2884_v0 }
 0x252   : > { %2487 = vmatmul.mubr.msk.bf16.vlgmr.msra.gmra.mrb[16].mxu1 %vm280_vm2, %v3115_v63  ;;  %v1032_v2 = vpop.permute.xlu0 %1031 }
 0x253   : > { %2495 = vmatmul.mubr.msk.bf16.vlgmr.msra.gmra.mrb[20].mxu0 %vm280_vm2, %v964_v29  ;;  %2500 = vmatprep.mubr.msk.bf16.mxu1 %vm2885_vm1, %v2884_v0 }
 0x254   : > { %2506 = vmatprep.mubr.msk.bf16.mxu0 %vm2885_vm1, %v2884_v0 }
 0x30a   : > { %v567_v30 = vpop.f32.mrb[4].mxu1 }
 0x30b   : > { %v622_v32 = vpop.f32.mrb[8].mxu0  ;;  %v2444_v35 = vpop.f32.mrb[5].mxu1 }
 0x30c   : > { %v623_v34 = vadd.f32 %v622_v32, %v567_v30  ;;  %v2450_v36 = vpop.f32.mrb[9].mxu0  ;;  %v570_v37 = vpop.f32.mrb[6].mxu1 }
 0x30d   : > { %v625_v38 = vpop.f32.mrb[10].mxu0  ;;  %v2445_v40 = vpop.f32.mrb[7].mxu1 }
 0x30e   : > { %v626_v39 = vadd.f32 %v625_v38, %v570_v37  ;;  %v2451_v41 = vpop.f32.mrb[11].mxu0  ;;  %v2731_v37 = vld [vmem:[#allocation4 + $0x10] sm:$0xff]   ;;  %v3176_v38 = vld [vmem:[#allocation4 + $0x18] sm:$0xff]  }
 0x313   : > { %v682_v42 = vpop.f32.mrb[8].mxu1 }
 0x314   : > { %v3157_v44 = vadd.f32 %v682_v42, %v623_v34  ;;  %v2456_v45 = vpop.f32.mrb[9].mxu1 }
 0x315   : > { %v685_v46 = vpop.f32.mrb[10].mxu1  ;;  %v768_v49 = vpop.f32.mrb[12].mxu0 }
 0x316   : > { %v3159_v47 = vadd.f32 %v685_v46, %v626_v39  ;;  %v2457_v48 = vpop.f32.mrb[11].mxu1  ;;  %v2464_v50 = vpop.f32.mrb[13].mxu0 }
 0x317   : > { %v771_v51 = vpop.f32.mrb[14].mxu0  ;;  %v2733_v48 = vld [vmem:[#allocation4 + $0x20] sm:$0xff]  }
 0x318   : > { %v2465_v52 = vpop.f32.mrb[15].mxu0 }
 0x31d   : > { %v823_v53 = vpop.f32.mrb[12].mxu1 }
 0x31e   : > { %v887_v54 = vpop.f32.mrb[16].mxu0  ;;  %v824_v55 = vadd.f32 %v823_v53, %v768_v49  ;;  %v2472_v56 = vpop.f32.mrb[13].mxu1 }
 0x31f   : > { %v2480_v57 = vpop.f32.mrb[17].mxu0  ;;  %v826_v58 = vpop.f32.mrb[14].mxu1 }
 0x320   : > { %v890_v59 = vpop.f32.mrb[18].mxu0  ;;  %v894_v60 = vadd.f32 %v887_v54, %v824_v55  ;;  %v827_v61 = vadd.f32 %v826_v58, %v771_v51  ;;  %v2473_v62 = vpop.f32.mrb[15].mxu1  ;;  %v3186_v51 = vld [vmem:[#allocation4] sm:$0xff]  }
 0x321   : > { %v2481_v63 = vpop.f32.mrb[19].mxu0 }
 0x322   : > { %v895_v1 = vadd.f32 %v890_v59, %v827_v61 }
 0x325   : > { %v953_v3 = vpop.f32.mrb[16].mxu1 }
 0x326   : > { %v1022_v4 = vpop.f32.mrb[20].mxu0  ;;  %v960_v5 = vadd.f32 %v953_v3, %v894_v60  ;;  %v2488_v8 = vpop.f32.mrb[17].mxu1 }
 0x327   : > { %v2496_v9 = vpop.f32.mrb[21].mxu0  ;;  %v956_v10 = vpop.f32.mrb[18].mxu1 }
 0x328   : > { %v1025_v11 = vpop.f32.mrb[22].mxu0  ;;  %v1029_v12 = vadd.f32 %v1022_v4, %v960_v5  ;;  %v961_v13 = vadd.f32 %v956_v10, %v895_v1  ;;  %v2489_v14 = vpop.f32.mrb[19].mxu1  ;;  %v1371_v9 = vpack.c.bf16 %v3069_v7, %v3067_v6 }
 0x329   : > { %v2497_v15 = vpop.f32.mrb[23].mxu0 }
 0x32a   : > { %v1030_v16 = vadd.f32 %v1025_v11, %v961_v13  ;;  %v1034_v17 = vadd.f32 %v1032_v2, %v1029_v12 }
 0x32c   : > { %v1035_v18 = vadd.f32 %v1032_v2, %v1030_v16  ;;  %v1036_v19 = vmul.f32 %v1034_v17, %v3088_v31 }
 0x32e   : > { %v1037_v20 = vmul.f32 %v1035_v18, %v3099_v43  ;;  %v1038_v21 = vmax.f32 %v1036_v19, 0.0 }
 0x330   : > { %1042 = vrot.lane.b32.xlu1 %v1038_v21, %s2888_s7  ;;  %v1039_v22 = vmax.f32 %v1037_v20, 0.0 }
 0x332   : > { %1044 = vrot.lane.b32.xlu0 %v1039_v22, %s2888_s7 }
 0x334   : > { %1068 = vrot.lane.b32.xlu1 %v3164_v23, %s2890_s25 }
 0x338   : > { %1123 = vrot.lane.b32.xlu1 %v2730_v24, %s2890_s25 }
 0x3a2   : > { %v1043_v25 = vpop.permute.xlu1 %1042 }
 0x3a3   : > { %1048 = vst.msk [vmem:[#allocation2 + $0x2] sm:$0xff] %vm505_vm3, %v1043_v25 }
 0x3a4   : > { %v1045_v26 = vpop.permute.xlu0 %1044 }
 0x3a5   : > { %1049 = vst.msk [vmem:[#allocation2 + $0xa] sm:$0xff] %vm505_vm3, %v1045_v26 }
 0x3a6   : > { %v1069_v27 = vpop.permute.xlu1 %1068 }
 0x3a7   : > { %2499 = vmatpush3.bf16.msra.mxu1 %v1069_v27 }
 0x3a8   : > { %2510 = vmatprep.subr.bf16.mxu1 %v2884_v0 }
 0x3aa   : > { %v1124_v28 = vpop.permute.xlu1 %1123  ;;  %v1055_v29 = vld [vmem:[#allocation2 + $0x1] sm:$0xff] }
 0x3ab   : > { %2505 = vmatpush3.bf16.msra.mxu0 %v1124_v28  ;;  %v1050_v32 = vld [vmem:[#allocation2] sm:$0xff] }
 0x3ac   : > { %v1056_v30 = vld [vmem:[#allocation2 + $0x9] sm:$0xff]  ;;  %2516 = vmatprep.subr.bf16.mxu0 %v2884_v0 }
 0x3ad   : > { %v1051_v34 = vld [vmem:[#allocation2 + $0x8] sm:$0xff]  ;;  %v1057_v35 = vpack.c.bf16 %v1056_v30, %v1055_v29 }
 0x3ae   : > { %v1052_v36 = vpack.c.bf16 %v1051_v34, %v1050_v32  ;;  %v1171_v39 = vld [vmem:[#allocation2 + $0xa] sm:$0xff]  ;;  %v1170_v42 = vld [vmem:[#allocation2 + $0x2] sm:$0xff] }
 0x3af   : > { %1061 = vrot.lane.b32.xlu0 %v1057_v35, %s2887_s17  ;;  %v1232_v40 = vld [vmem:[#allocation2 + $0x3] sm:$0xff]  ;;  %v1233_v41 = vld [vmem:[#allocation2 + $0xb] sm:$0xff]  ;;  %v1172_v45 = vpack.c.bf16 %v1171_v39, %v1170_v42 }
 0x3b0   : > { %1116 = vrot.lane.b32.xlu1 %v1052_v36, %s2887_s17  ;;  %v1234_v46 = vpack.c.bf16 %v1233_v41, %v1232_v40  ;;  %v1294_v49 = vld [vmem:[#allocation2 + $0x4] sm:$0xff]  ;;  %v1295_v50 = vld [vmem:[#allocation2 + $0xc] sm:$0xff] }
 0x3b1   : > { %v1296_v52 = vpack.c.bf16 %v1295_v50, %v1294_v49 }
 0x3b3   : > { %1183 = vrot.lane.b32.xlu0 %v2731_v37, %s2890_s25 }
 0x3b4   : > { %1245 = vrot.lane.b32.xlu1 %v3176_v38, %s2890_s25 }
 0x3b7   : > { %1176 = vrot.lane.b32.xlu0 %v1172_v45, %s2887_s17 }
 0x3b8   : > { %1238 = vrot.lane.b32.xlu1 %v1234_v46, %s2887_s17 }
 0x3bb   : > { %1307 = vrot.lane.b32.xlu0 %v2733_v48, %s2890_s25 }
 0x3bc   : > { %697 = vrot.lane.b32.xlu1 %v3093_v33, %s2887_s17 }
 0x3bf   : > { %1300 = vrot.lane.b32.xlu0 %v1296_v52, %s2887_s17 }
 0x3c0   : > { %1427 = vrot.lane.b32.xlu1 %v3186_v51, %s2891_s26 }
 0x3c3   : > { %1375 = vrot.lane.b32.xlu0 %v2731_v37, %s2891_s26 }
 0x3c4   : > { %1429 = vrot.lane.b32.xlu1 %v3164_v23, %s2891_s26 }
 0x3c7   : > { %1362 = vrot.lane.b32.xlu0 %v3093_v33, %s2890_s25  ;;  %s2339_s25 = sshll.u32 %s2950_s22, 4  ;;  %s2898_s22 = smov [#allocation9]  }
 0x3c8   : > { %1527 = vrot.lane.b32.xlu1 %v3093_v33, %s2891_s26  ;;  %s2810_s12 = sshll.u32 %s2898_s22, 4  ;;  %s2811_s12 = int_to_ptr.vmem [resolvable:$false] %s2810_s12 }
 0x3cb   : > { %1478 = vrot.lane.b32.xlu0 %v3176_v38, %s2891_s26 }
 0x421   : > { %v1062_v53 = vpop.permute.xlu0 %1061 }
 0x422   : > { %v1117_v54 = vpop.permute.xlu1 %1116  ;;  %2501 = vmatmul.mubr.msk.bf16.vlgmr.msra.gmra.mrb[20].mxu1 %vm529_vm4, %v1062_v53 }
 0x423   : > { %2507 = vmatmul.mubr.msk.bf16.vlgmr.msra.gmra.mrb[24].mxu0 %vm529_vm4, %v1117_v54  ;;  %2512 = vmatprep.mubr.msk.bf16.mxu1 %vm2885_vm1, %v2884_v0 }
 0x424   : > { %2518 = vmatprep.mubr.msk.bf16.mxu0 %vm2885_vm1, %v2884_v0 }
 0x425   : > { %v1184_v55 = vpop.permute.xlu0 %1183 }
 0x426   : > { %v1246_v56 = vpop.permute.xlu1 %1245  ;;  %2511 = vmatpush3.bf16.msra.mxu1 %v1184_v55 }
 0x427   : > { %2517 = vmatpush3.bf16.msra.mxu0 %v1246_v56  ;;  %2522 = vmatprep.subr.bf16.mxu1 %v2884_v0 }
 0x428   : > { %2528 = vmatprep.subr.bf16.mxu0 %v2884_v0 }
 0x429   : > { %v1177_v57 = vpop.permute.xlu0 %1176 }
 0x42a   : > { %v1239_v58 = vpop.permute.xlu1 %1238  ;;  %2513 = vmatmul.mubr.msk.bf16.vlgmr.msra.gmra.mrb[24].mxu1 %vm529_vm4, %v1177_v57 }
 0x42b   : > { %2519 = vmatmul.mubr.msk.bf16.vlgmr.msra.gmra.mrb[28].mxu0 %vm529_vm4, %v1239_v58  ;;  %2524 = vmatprep.mubr.msk.bf16.mxu1 %vm2885_vm1, %v2884_v0 }
 0x42c   : > { %2530 = vmatprep.mubr.msk.bf16.mxu0 %vm2885_vm1, %v2884_v0 }
 0x42d   : > { %v1308_v59 = vpop.permute.xlu0 %1307 }
 0x42e   : > { %v698_v60 = vpop.permute.xlu1 %697  ;;  %2523 = vmatpush3.bf16.msra.mxu1 %v1308_v59 }
 0x42f   : > { %v700_v61 = vadd.f32 %v698_v60, %v3157_v44  ;;  %v701_v62 = vadd.f32 %v698_v60, %v3159_v47  ;;  %2534 = vmatprep.subr.bf16.mxu1 %v2884_v0 }
 0x431   : > { %v702_v63 = vmul.f32 %v700_v61, %v3088_v31  ;;  %v703_v1 = vmul.f32 %v701_v62, %v3099_v43  ;;  %v1301_v2 = vpop.permute.xlu0 %1300 }
 0x432   : > { %v1428_v3 = vpop.permute.xlu1 %1427  ;;  %2525 = vmatmul.mubr.msk.bf16.vlgmr.msra.gmra.mrb[28].mxu1 %vm529_vm4, %v1301_v2 }
 0x433   : > { %v704_v4 = vmax.f32 %v702_v63, 0.0  ;;  %v705_v5 = vmax.f32 %v703_v1, 0.0  ;;  %2535 = vmatpush3.bf16.msra.mxu1 %v1428_v3  ;;  %2538 = vmatprep.mubr.msk.bf16.mxu1 %vm2885_vm1, %v2884_v0 }
 0x434   : > { %2536 = vmatprep.subr.bf16.mxu1 %v2884_v0 }
 0x435   : > { %v1374_v44 = vpack.c.bf16 %v705_v5, %v704_v4  ;;  %v1376_v47 = vpop.permute.xlu0 %1375 }
 0x436   : > { %v1430_v8 = vpop.permute.xlu1 %1429  ;;  %2529 = vmatpush3.bf16.msra.mxu0 %v1376_v47 }
 0x437   : > { %2537 = vmatpush3.bf16.msra.mxu1 %v1430_v8  ;;  %2542 = vmatprep.subr.bf16.mxu0 %v2884_v0 }
 0x438   : > { %2548 = vmatprep.subr.bf16.mxu1 %v2884_v0 }
 0x439   : > { %2531 = vmatmul.mubr.msk.bf16.vlgmr.msra.gmra.mrb[32].mxu0 %vm529_vm4, %v1374_v44  ;;  %v1363_v10 = vpop.permute.xlu0 %1362 }
 0x43a   : > { %2539 = vmatmul.mubr.msk.bf16.vlgmr.msra.gmra.mrb[32].mxu1 %vm280_vm2, %v1371_v9  ;;  %2544 = vmatprep.mubr.msk.bf16.mxu0 %vm2885_vm1, %v2884_v0  ;;  %v1528_v1 = vpop.permute.xlu1 %1527 }
 0x43b   : > { %2552 = vmatprep.mubr.msk.bf16.mxu1 %vm2885_vm1, %v2884_v0 }
 0x43d   : > { %v1479_v11 = vpop.permute.xlu0 %1478 }
 0x43e   : > { %2543 = vmatpush3.bf16.msra.mxu0 %v1479_v11 }
 0x43f   : > { %2556 = vmatprep.subr.bf16.mxu0 %v2884_v0 }
 0x4f5   : > { %v1108_v6 = vpop.f32.mrb[20].mxu1 }
 0x4f6   : > { %v1163_v7 = vpop.f32.mrb[24].mxu0  ;;  %v2502_v13 = vpop.f32.mrb[21].mxu1 }
 0x4f7   : > { %v1164_v12 = vadd.f32 %v1163_v7, %v1108_v6  ;;  %v2508_v14 = vpop.f32.mrb[25].mxu0  ;;  %v1111_v15 = vpop.f32.mrb[22].mxu1  ;;  %v2323_v13 = vld [vmem:[%s3363_s4 + $0x1] ss:$0 sm:$0xff] }
 0x4f8   : > { %v1166_v16 = vpop.f32.mrb[26].mxu0  ;;  %v2503_v18 = vpop.f32.mrb[23].mxu1  ;;  %v2735_v14 = vld [vmem:[#allocation4 + $0x10] sm:$0xff]  }
 0x4f9   : > { %v1167_v17 = vadd.f32 %v1166_v16, %v1111_v15  ;;  %v2509_v19 = vpop.f32.mrb[27].mxu0  ;;  %v2740_v15 = vld [vmem:[#allocation4 + $0x20] sm:$0xff]   ;;  %v2741_v16 = vld [vmem:[#allocation4 + $0x28] sm:$0xff]  }
 0x4fd   : > { %v1223_v20 = vpop.f32.mrb[24].mxu1 }
 0x4fe   : > { %v1285_v21 = vpop.f32.mrb[28].mxu0  ;;  %v1230_v22 = vadd.f32 %v1223_v20, %v1164_v12  ;;  %v2514_v24 = vpop.f32.mrb[25].mxu1 }
 0x4ff   : > { %v2520_v25 = vpop.f32.mrb[29].mxu0  ;;  %v1226_v26 = vpop.f32.mrb[26].mxu1 }
 0x500   : > { %v1288_v27 = vpop.f32.mrb[30].mxu0  ;;  %v1292_v28 = vadd.f32 %v1285_v21, %v1230_v22  ;;  %v1231_v29 = vadd.f32 %v1226_v26, %v1167_v17  ;;  %v2515_v30 = vpop.f32.mrb[27].mxu1 }
 0x501   : > { %v2521_v32 = vpop.f32.mrb[31].mxu0 }
 0x502   : > { %v1293_v34 = vadd.f32 %v1288_v27, %v1231_v29  ;;  %v2736_v27 = vld [vmem:[#allocation4] sm:$0xff]   ;;  %v2737_v29 = vld [vmem:[#allocation4 + $0x8] sm:$0xff]  }
 0x505   : > { %v1347_v35 = vpop.f32.mrb[28].mxu1 }
 0x506   : > { %v1354_v36 = vadd.f32 %v1347_v35, %v1292_v28  ;;  %v2526_v37 = vpop.f32.mrb[29].mxu1 }
 0x507   : > { %v1350_v39 = vpop.f32.mrb[30].mxu1 }
 0x508   : > { %v1365_v40 = vadd.f32 %v1363_v10, %v1354_v36  ;;  %v1355_v41 = vadd.f32 %v1350_v39, %v1293_v34  ;;  %v2527_v42 = vpop.f32.mrb[31].mxu1 }
 0x50a   : > { %v1367_v45 = vmul.f32 %v1365_v40, %v3088_v31  ;;  %v1366_v46 = vadd.f32 %v1363_v10, %v1355_v41 }
 0x50c   : > { %v1368_v48 = vmul.f32 %v1366_v46, %v3099_v43  ;;  %v1415_v49 = vpop.f32.mrb[32].mxu0  ;;  %v1369_v53 = vmax.f32 %v1367_v45, 0.0 }
 0x50d   : > { %v2532_v50 = vpop.f32.mrb[33].mxu0  ;;  %v1470_v52 = vpop.f32.mrb[32].mxu1 }
 0x50e   : > { %v1370_v54 = vmax.f32 %v1368_v48, 0.0  ;;  %v1471_v55 = vadd.f32 %v1470_v52, %v1415_v49  ;;  %v1418_v56 = vpop.f32.mrb[34].mxu0  ;;  %v2540_v57 = vpop.f32.mrb[33].mxu1 }
 0x50f   : > { %v2533_v58 = vpop.f32.mrb[35].mxu0  ;;  %v1473_v59 = vpop.f32.mrb[34].mxu1 }
 0x510   : > { %v1477_v60 = vpack.c.bf16 %v1370_v54, %v1369_v53  ;;  %v1474_v61 = vadd.f32 %v1473_v59, %v1418_v56  ;;  %v2541_v62 = vpop.f32.mrb[35].mxu1 }
 0x512   : > { %2545 = vmatmul.mubr.msk.bf16.vlgmr.msra.gmra.mrb[36].mxu0 %vm529_vm4, %v1477_v60 }
 0x513   : > { %2560 = vmatprep.mubr.msk.bf16.mxu0 %vm2885_vm1, %v2884_v0 }
 0x5e5   : > { %v1518_v63 = vpop.f32.mrb[36].mxu0 }
 0x5e6   : > { %v1525_v2 = vadd.f32 %v1518_v63, %v1471_v55  ;;  %v2546_v3 = vpop.f32.mrb[37].mxu0 }
 0x5e7   : > { %v1521_v4 = vpop.f32.mrb[38].mxu0 }
 0x5e8   : > { %v1530_v5 = vadd.f32 %v1528_v1, %v1525_v2  ;;  %v1526_v44 = vadd.f32 %v1521_v4, %v1474_v61  ;;  %v2547_v47 = vpop.f32.mrb[39].mxu0 }
 0x5ea   : > { %v1531_v8 = vadd.f32 %v1528_v1, %v1526_v44  ;;  %v1532_v9 = vmul.f32 %v1530_v5, %v3088_v31  ;;  %v2738_v31 = vld [vmem:[#allocation4 + $0x10] sm:$0xff]  }
 0x5ec   : > { %v1534_v10 = vmax.f32 %v1532_v9, 0.0  ;;  %v1533_v11 = vmul.f32 %v1531_v8, %v3099_v43  ;;  %v2739_v43 = vld [vmem:[#allocation4 + $0x18] sm:$0xff]  }
 0x5ee   : > { %v1537_v6 = vsel %vm280_vm2, %v1534_v10, 0.0  ;;  %v1535_v7 = vmax.f32 %v1533_v11, 0.0 }
 0x5ef   : > { %1538 = vadd.xlane.f32.xlu0 %v1537_v6 }
 0x5f0   : > { %v1540_v12 = vsel %vm280_vm2, %v1535_v7, 0.0 }
 0x5f1   : > { %1541 = vadd.xlane.f32.xlu1 %v1540_v12 }
 0x602   : > { %1569 = vrot.lane.b32.xlu1 %v2323_v13, %s2892_s8 }
 0x606   : > { %1594 = vrot.lane.b32.xlu1 %v2735_v14, %s2888_s7 }
 0x60a   : > { %1596 = vrot.lane.b32.xlu1 %v3176_v38, %s2888_s7 }
 0x60e   : > { %1730 = vrot.lane.b32.xlu1 %v2738_v31, %s2893_s10 }
 0x612   : > { %1732 = vrot.lane.b32.xlu1 %v2739_v43, %s2893_s10 }
 0x616   : > { %1850 = vrot.lane.b32.xlu1 %v2740_v15, %s2893_s10 }
 0x61a   : > { %1852 = vrot.lane.b32.xlu1 %v2741_v16, %s2893_s10 }
 0x61e   : > { %1693 = vrot.lane.b32.xlu1 %v3093_v33, %s2888_s7 }
 0x67c   : > { %v1539_v17 = vpop.xlane.xlu0 %1538 }
 0x67d   : > { %v1544_v18 = vmul.f32 0.03125, %v1539_v17 }
 0x67e   : > { %v1542_v19 = vpop.xlane.xlu1 %1541 }
 0x67f   : > { %v1546_v38 = vsub.f32 %v1534_v10, %v1544_v18  ;;  %v1545_v20 = vmul.f32 0.03125, %v1542_v19 }
 0x681   : > { %v1547_v21 = vsub.f32 %v1535_v7, %v1545_v20  ;;  %v1548_v22 = vmul.f32 %v1546_v38, %v1546_v38 }
 0x682   : > { %v1570_v28 = vpop.permute.xlu1 %1569 }
 0x683   : > { %v1550_v24 = vsel %vm280_vm2, %v1548_v22, 0.0  ;;  %v1549_v25 = vmul.f32 %v1547_v21, %v1547_v21 }
 0x684   : > { %1551 = vadd.xlane.f32.xlu0 %v1550_v24 }
 0x685   : > { %v1553_v26 = vsel %vm280_vm2, %v1549_v25, 0.0 }
 0x686   : > { %v1595_v30 = vpop.permute.xlu1 %1594 }
 0x687   : > { %2549 = vmatpush3.bf16.msra.mxu1 %v1595_v30 }
 0x688   : > { %1554 = vadd.xlane.f32.xlu0 %v1553_v26  ;;  %2550 = vmatprep.subr.bf16.mxu1 %v2884_v0 }
 0x68a   : > { %v1597_v32 = vpop.permute.xlu1 %1596 }
 0x68b   : > { %2551 = vmatpush3.bf16.msra.mxu1 %v1597_v32 }
 0x68c   : > { %2564 = vmatprep.subr.bf16.mxu1 %v2884_v0 }
 0x68e   : > { %v1731_v55 = vpop.permute.xlu1 %1730 }
 0x692   : > { %v1733_v61 = vpop.permute.xlu1 %1732 }
 0x696   : > { %v1851_v62 = vpop.permute.xlu1 %1850 }
 0x69a   : > { %v1853_v63 = vpop.permute.xlu1 %1852 }
 0x69e   : > { %1574 = vrot.lane.b32.xlu0 %v2323_v13, %s2894_s9  ;;  %v1694_v47 = vpop.permute.xlu1 %1693 }
 0x6a2   : > { %1644 = vrot.lane.b32.xlu0 %v3186_v51, %s2888_s7 }
 0x6a6   : > { %1646 = vrot.lane.b32.xlu0 %v3164_v23, %s2888_s7 }
 0x6aa   : > { %1787 = vrot.lane.b32.xlu0 %v2736_v27, %s2893_s10 }
 0x6ae   : > { %1789 = vrot.lane.b32.xlu0 %v2737_v29, %s2893_s10 }
 0x6b2   : > { %1908 = vrot.lane.b32.xlu0 %v3093_v33, %s2893_s10 }
 0x711   : > { %v1552_v51 = vpop.xlane.xlu0 %1551 }
 0x712   : > { %v1556_v23 = vmul.f32 0.03125, %v1552_v51 }
 0x714   : > { %v1558_v34 = vadd.f32 1e-05, %v1556_v23 }
 0x715   : > { %v1555_v35 = vpop.xlane.xlu0 %1554 }
 0x716   : > { %2742 = vrsqrt.f32 %v1558_v34  ;;  %v1557_v36 = vmul.f32 0.03125, %v1555_v35 }
 0x718   : > { %v1559_v37 = vadd.f32 1e-05, %v1557_v36 }
 0x719   : > { %v1575_v39 = vpop.permute.xlu0 %1574 }
 0x71a   : > { %2744 = vrsqrt.f32 %v1559_v37 }
 0x71d   : > { %v1645_v40 = vpop.permute.xlu0 %1644 }
 0x71e   : > { %2557 = vmatpush3.bf16.msra.mxu0 %v1645_v40 }
 0x71f   : > { %2558 = vmatprep.subr.bf16.mxu0 %v2884_v0 }
 0x720   : > { %v2743_v41 = vpop.eup %2742 }
 0x721   : > { %v1562_v42 = vmul.f32 %v2743_v41, %v1546_v38  ;;  %v1647_v45 = vpop.permute.xlu0 %1646 }
 0x722   : > { %2559 = vmatpush3.bf16.msra.mxu0 %v1647_v45 }
 0x723   : > { %2572 = vmatprep.subr.bf16.mxu0 %v2884_v0  ;;  %v1572_v48 = vmul.f32 %v1570_v28, %v1562_v42 }
 0x724   : > { %v2745_v33 = vpop.eup %2744 }
 0x725   : > { %v1563_v46 = vmul.f32 %v2745_v33, %v1547_v21  ;;  %v1577_v50 = vadd.f32 %v1575_v39, %v1572_v48  ;;  %v1788_v53 = vpop.permute.xlu0 %1787 }
 0x727   : > { %v1573_v49 = vmul.f32 %v1570_v28, %v1563_v46 }
 0x729   : > { %v1578_v52 = vadd.f32 %v1575_v39, %v1573_v49  ;;  %v1790_v57 = vpop.permute.xlu0 %1789 }
 0x72b   : > { %v1579_v54 = vpack.c.bf16 %v1578_v52, %v1577_v50 }
 0x72d   : > { %2561 = vmatmul.mubr.msk.bf16.vlgmr.msra.gmra.mrb[40].mxu0 %vm280_vm2, %v1579_v54  ;;  %v1585_v56 = vshll.u32 %v1579_v54, 16  ;;  %v1583_v58 = vshrl.u32 %v1579_v54, 16  ;;  %v1839_v1 = vrot.slane %v1579_v54, 1  ;;  %v1909_v29 = vpop.permute.xlu0 %1908 }
 0x72e   : > { %2573 = vmatpush3.bf16.msra.mxu0 %v1788_v53  ;;  %2576 = vmatprep.mubr.msk.bf16.mxu0 %vm2885_vm1, %v2884_v0 }
 0x72f   : > { %2574 = vmatprep.subr.bf16.mxu0 %v2884_v0  ;;  %v1587_v59 = vrot.slane %v1585_v56, 1 }
 0x731   : > { %v1588_v60 = vor.u32 %v1587_v59, %v1583_v58  ;;  %v1933_v58 = vld [vmem:[%s3363_s4 + $0x2] sm:$0x1] }
 0x732   : > { %2575 = vmatpush3.bf16.msra.mxu0 %v1790_v57 }
 0x733   : > { %2553 = vmatmul.mubr.msk.bf16.vlgmr.msra.gmra.mrb[36].mxu1 %vm280_vm2, %v1588_v60 }
 0x734   : > { %2565 = vmatpush3.bf16.msra.mxu1 %v1731_v55  ;;  %2568 = vmatprep.mubr.msk.bf16.mxu1 %vm2885_vm1, %v2884_v0 }
 0x735   : > { %2577 = vmatmul.mubr.msk.bf16.vlgmr.msra.gmra.mrb[44].mxu0 %vm280_vm2, %v1579_v54  ;;  %2566 = vmatprep.subr.bf16.mxu1 %v2884_v0 }
 0x736   : > { %2596 = vmatprep.mubr.msk.f32.mxu0 %vm2885_vm1, %v2884_v0 }
 0x738   : > { %2567 = vmatpush3.bf16.msra.mxu1 %v1733_v61 }
 0x739   : > { %2580 = vmatprep.subr.bf16.mxu1 %v2884_v0 }
 0x73b   : > { %2569 = vmatmul.mubr.msk.bf16.vlgmr.msra.gmra.mrb[40].mxu1 %vm280_vm2, %v1588_v60 }
 0x73c   : > { %2581 = vmatpush3.bf16.msra.mxu1 %v1851_v62  ;;  %2584 = vmatprep.mubr.msk.bf16.mxu1 %vm2885_vm1, %v2884_v0 }
 0x73d   : > { %2582 = vmatprep.subr.bf16.mxu1 %v2884_v0 }
 0x740   : > { %2583 = vmatpush3.bf16.msra.mxu1 %v1853_v63 }
 0x743   : > { %2585 = vmatmul.mubr.msk.bf16.vlgmr.msra.gmra.mrb[44].mxu1 %vm280_vm2, %v1839_v1  ;;  %v1932_v1 = vld [vmem:[%s3363_s4 + $0x1] sm:$0x3] }
 0x744   : > { %2607 = vmatprep.mubr.msk.f32.mxu1 %vm2885_vm1, %v2884_v0 }
 0x800   : > { %v1686_v2 = vpop.f32.mrb[40].mxu0 }
 0x801   : > { %v2562_v3 = vpop.f32.mrb[41].mxu0 }
 0x802   : > { %v1689_v4 = vpop.f32.mrb[42].mxu0  ;;  %v1961_v3 = vld [vmem:[#allocation7] sm:$0xff] }
 0x803   : > { %v2563_v5 = vpop.f32.mrb[43].mxu0 }
 0x804   : > { %v1963_v5 = vld [vmem:[#allocation7 + $0x10] sm:$0xff] }
 0x806   : > { %v1637_v44 = vpop.f32.mrb[36].mxu1 }
 0x807   : > { %v1687_v8 = vadd.f32 %v1686_v2, %v1637_v44  ;;  %v2554_v9 = vpop.f32.mrb[37].mxu1  ;;  %v2896_v2 = vmov 0.0|0.0  }
 0x808   : > { %v1827_v10 = vpop.f32.mrb[44].mxu0  ;;  %v1640_v11 = vpop.f32.mrb[38].mxu1  ;;  %2610 = vmatprep.subr.bf16.mxu0 %v2896_v2  ;;  %2616 = vmatprep.subr.bf16.mxu1 %v2896_v2 }
 0x809   : > { %v1696_v6 = vadd.f32 %v1694_v47, %v1687_v8  ;;  %v1690_v7 = vadd.f32 %v1689_v4, %v1640_v11  ;;  %v2555_v12 = vpop.f32.mrb[39].mxu1  ;;  %v2578_v13 = vpop.f32.mrb[45].mxu0  ;;  %v1962_v4 = vld [vmem:[#allocation7 + $0x8] sm:$0xff] }
 0x80a   : > { %v1830_v14 = vpop.f32.mrb[46].mxu0  ;;  %v2611_v44 = vpack.c.bf16 %v1962_v4, %v1961_v3 }
 0x80b   : > { %v1698_v31 = vmax.f32 %v1696_v6, 0.0  ;;  %v1697_v43 = vadd.f32 %v1694_v47, %v1690_v7  ;;  %v2579_v15 = vpop.f32.mrb[47].mxu0  ;;  %v1964_v47 = vld [vmem:[#allocation7 + $0x18] sm:$0xff] }
 0x80c   : > { %2612 = vmatpush3.bf16.msra.mxu0 %v2611_v44  ;;  %v2614_v8 = vpack.c.bf16 %v1964_v47, %v1963_v5 }
 0x80d   : > { %v1699_v0 = vmax.f32 %v1697_v43, 0.0  ;;  %v1700_v17 = vsel %vm529_vm4, %v1698_v31, -inf  ;;  %2613 = vmatprep.subr.bf16.mxu0 %v2896_v2 }
 0x80e   : > { %v1770_v16 = vpop.f32.mrb[40].mxu1 }
 0x80f   : > { %v1702_v18 = vsel %vm1701_vm5, %v1699_v0, -inf  ;;  %v1828_v19 = vadd.f32 %v1827_v10, %v1770_v16  ;;  %v2570_v38 = vpop.f32.mrb[41].mxu1  ;;  %v1965_v0 = vld [vmem:[%s3363_s4 + $0x1] sm:$0x1] }
 0x810   : > { %v1703_v20 = vmax.f32 %v1700_v17, %v1702_v18  ;;  %v1773_v21 = vpop.f32.mrb[42].mxu1  ;;  %2615 = vmatpush3.bf16.msra.mxu0 %v2614_v8  ;;  %v2052_v38 = vlaneseq }
 0x811   : > { %v1831_v22 = vadd.f32 %v1830_v14, %v1773_v21  ;;  %v2571_v24 = vpop.f32.mrb[43].mxu1 }
 0x812   : > { %v1704_v25 = vrot.slane %v1703_v20, 4 }
 0x814   : > { %v1705_v26 = vmax.f32 %v1703_v20, %v1704_v25  ;;  %v2053_v20 = vshrl.u32 %v2052_v38, 7 }
 0x816   : > { %v1706_v27 = vrot.slane %v1705_v26, 2  ;;  %v1893_v28 = vpop.f32.mrb[44].mxu1  ;;  %v2054_v21 = vsub.s32 0, %v2053_v20 }
 0x817   : > { %v1900_v30 = vadd.f32 %v1893_v28, %v1828_v19  ;;  %v2586_v32 = vpop.f32.mrb[45].mxu1 }
 0x818   : > { %v1707_v51 = vmax.f32 %v1705_v26, %v1706_v27  ;;  %v1896_v23 = vpop.f32.mrb[46].mxu1  ;;  %v2055_v24 = vrot.slane %v1933_v58, %v2054_v21  ;;  %v2084_v25 = vrot.slane %v1965_v0, %v2054_v21  ;;  %v2701_v32 = vpack.i.bf16 %v1962_v4, %v1961_v3 }
 0x819   : > { %v1911_v34 = vadd.f32 %v1909_v29, %v1900_v30  ;;  %v1901_v35 = vadd.f32 %v1896_v23, %v1831_v22  ;;  %v2587_v36 = vpop.f32.mrb[47].mxu1  ;;  %v2706_v22 = vpack.i.bf16 %v1964_v47, %v1963_v5 }
 0x81a   : > { %v1708_v37 = vrot.slane %v1707_v51, 1 }
 0x81b   : > { %v1913_v39 = vmax.f32 %v1911_v34, 0.0  ;;  %v1912_v40 = vadd.f32 %v1909_v29, %v1901_v35 }
 0x81c   : > { %v1709_v41 = vmax.f32 %v1707_v51, %v1708_v37 }
 0x81d   : > { %v1914_v42 = vmax.f32 %v1912_v40, 0.0  ;;  %v1915_v45 = vsel %vm529_vm4, %v1913_v39, -inf }
 0x81e   : > { %1711 = vst.msk [vmem:[#allocation3] sm:$0x1] %vm1710_vm6, %v1709_v41 }
 0x81f   : > { %v1917_v33 = vsel %vm1916_vm7, %v1914_v42, -inf }
 0x820   : > { %v1918_v46 = vmax.f32 %v1915_v45, %v1917_v33 }
 0x822   : > { %v1919_v48 = vrot.slane %v1918_v46, 4 }
 0x824   : > { %v1920_v49 = vmax.f32 %v1918_v46, %v1919_v48 }
 0x826   : > { %v1921_v50 = vrot.slane %v1920_v49, 2 }
 0x828   : > { %v1922_v52 = vmax.f32 %v1920_v49, %v1921_v50 }
 0x82a   : > { %v1923_v53 = vrot.slane %v1922_v52, 1 }
 0x82c   : > { %v1924_v54 = vmax.f32 %v1922_v52, %v1923_v53 }
 0x82e   : > { %1926 = vrot.lane.b32.xlu0 %v1924_v54, %s2893_s10  ;;  %s3317_s10 = scalar_lea.hbm %s3364_s5, %s2339_s25 }
 0x8a0   : > { %v1927_v55 = vpop.permute.xlu0 %1926 }
 0x8a1   : > { %1930 = vst.msk [vmem:[#allocation3] sm:$0x1] %vm1929_vm8, %v1927_v55 }
 0x8a8   : > { %v1931_v56 = vld [vmem:[#allocation3] sm:$0x1] }
 0x8a9   : > { %v1935_v57 = vsel %vm1934_vm9, %v1931_v56, 0.0 }
 0x8aa   : > { %1936 = vadd.xlane.f32.xlu1 %v1935_v57 }
 0x8bb   : > { %1957 = vrot.lane.b32.xlu1 %v1933_v58, %s2895_s13  ;;  %s2812_s13 = scalar_lea.vmem %s2811_s12, 32 }
 0x937   : > { %v1937_v59 = vpop.xlane.xlu1 %1936 }
 0x938   : > { %v1938_v60 = vmul.f32 0.03125, %v1937_v59 }
 0x93a   : > { %v1939_v61 = vsub.f32 %v1931_v56, %v1938_v60 }
 0x93b   : > { %v1958_v31 = vpop.permute.xlu1 %1957 }
 0x93c   : > { %v1940_v62 = vmul.f32 %v1939_v61, %v1939_v61 }
 0x93e   : > { %v1941_v63 = vsel %vm1934_vm9, %v1940_v62, 0.0 }
 0x93f   : > { %1942 = vadd.xlane.f32.xlu0 %v1941_v63 }
 0x955   : > { %1949 = vrot.lane.b32.xlu0 %v1932_v1, %s2897_s16 }
 0x9cc   : > { %v1943_v9 = vpop.xlane.xlu0 %1942 }
 0x9cd   : > { %v1944_v10 = vmul.f32 0.03125, %v1943_v9 }
 0x9cf   : > { %v1945_v11 = vadd.f32 1e-05, %v1944_v10 }
 0x9d0   : > { %v1950_v6 = vpop.permute.xlu0 %1949 }
 0x9d1   : > { %2746 = vrsqrt.f32 %v1945_v11  ;;  %v1951_v7 = vrot.slane %v1950_v6, 1 }
 0x9d3   : > { %v1953_v14 = vsel %vm1952_vm10, %v1950_v6, %v1951_v7 }
 0x9db   : > { %v2747_v12 = vpop.eup %2746 }
 0x9dc   : > { %v1947_v13 = vmul.f32 %v2747_v12, %v1939_v61 }
 0x9de   : > { %v1955_v43 = vmul.f32 %v1953_v14, %v1947_v13 }
 0x9e0   : > { %v1960_v15 = vadd.f32 %v1958_v31, %v1955_v43 }
 0x9e2   : > { %2597 = vmatmul.mubr.msk.f32.vlgmr.msra.gmra.mrb[48].mxu0 %vm280_vm2, %v1960_v15 }
 0xab5   : > { %v2035_v16 = vpop.f32.mrb[48].mxu0 }
 0xab6   : > { %v2036_v17 = vadd.f32 %v2035_v16, %v1965_v0  ;;  %v2598_v18 = vpop.f32.mrb[49].mxu0 }
 0xab8   : > { %v2039_v19 = vsel %vm1934_vm9, %v2036_v17, 0.0 }
 0xab9   : > { %2040 = vadd.xlane.f32.xlu1 %v2039_v19 }
 0xaca   : > { %2707 = vrot.lane.b32.xlu1 %v2706_v22, %s2887_s17 }
 0xace   : > { %2056 = vrot.lane.b32.xlu1 %v2055_v24, %s2892_s8 }
 0xad2   : > { %2085 = vrot.lane.b32.xlu1 %v2084_v25, %s2887_s17 }
 0xb46   : > { %v2041_v26 = vpop.xlane.xlu1 %2040 }
 0xb47   : > { %v2042_v27 = vmul.f32 0.03125, %v2041_v26 }
 0xb49   : > { %v2043_v28 = vsub.f32 %v2036_v17, %v2042_v27 }
 0xb4a   : > { %v2708_v34 = vpop.permute.xlu1 %2707 }
 0xb4b   : > { %v2044_v29 = vmul.f32 %v2043_v28, %v2043_v28  ;;  %v2710_v37 = vunpack.i.h.bf16 %v2708_v34  ;;  %v2709_v41 = vunpack.i.l.bf16 %v2708_v34 }
 0xb4d   : > { %v2045_v30 = vsel %vm1934_vm9, %v2044_v29, 0.0  ;;  %v2620_v45 = vpack.c.bf16 %v2710_v37, %v2709_v41 }
 0xb4e   : > { %2046 = vadd.xlane.f32.xlu0 %v2045_v30  ;;  %v2057_v46 = vpop.permute.xlu1 %2056 }
 0xb52   : > { %v2086_v53 = vpop.permute.xlu1 %2085 }
 0xb64   : > { %2702 = vrot.lane.b32.xlu0 %v2701_v32, %s2887_s17  ;;  %s260_s17 = sand.u32 1, %s2868_s19  }
 0xb65   : > { %s261_s26 = scalar_lea.vmem [#allocation9], %s260_s17 }
 0xb66   : > { %s2176_s6 = sshll.u32 %s261_s26, 4  ;;  %s3319_s6 = int_to_ptr.vmem [resolvable:$true] %s2176_s6 }
 0xb67   : > { %s2806_s11 = scalar_lea.vmem %s3319_s6, 16  ;;  %p2813_p4 = scmp.lt.s32.totalorder %s3319_s6, %s2811_s12 }
 0xb68   : > { %2060 = vrot.lane.b32.xlu0 %v2055_v24, %s2894_s9  ;;  %s2164_s9 = scalar_lea.sflag [#allocation6], %s260_s17  ;;  %p2807_p12 = scmp.ne.s32.totalorder %s3319_s6, %s2806_s11 }
 0xb69   : > { %p2814_p7 = scmp.lt.s32.totalorder %s2812_s13, %s2806_s11 }
 0xb6a   : > { %p2808_p2 = pnand %p2807_p12, %p3377_p1 }
 0xb6b   : > { %p2815_p8 = por %p2814_p7, %p2813_p4 }
 0xb6c   : > { %p2809_p3 = pneg %p2808_p2 }
 0xb6e   : > { %p2816_p11 = pnand %p2815_p8, %p2809_p3 }
 0xbdb   : > { %v2047_v51 = vpop.xlane.xlu0 %2046 }
 0xbdc   : > { %v2048_v23 = vmul.f32 0.03125, %v2047_v51 }
 0xbde   : > { %v2049_v35 = vadd.f32 1e-05, %v2048_v23 }
 0xbdf   : > { %v2703_v36 = vpop.permute.xlu0 %2702 }
 0xbe0   : > { %2748 = vrsqrt.f32 %v2049_v35  ;;  %v2705_v39 = vunpack.i.h.bf16 %v2703_v36  ;;  %v2704_v40 = vunpack.i.l.bf16 %v2703_v36 }
 0xbe2   : > { %v2617_v42 = vpack.c.bf16 %v2705_v39, %v2704_v40 }
 0xbe3   : > { %v2061_v49 = vpop.permute.xlu0 %2060 }
 0xbe4   : > { %2618 = vmatpush3.bf16.msra.mxu1 %v2617_v42 }
 0xbe5   : > { %2619 = vmatprep.subr.bf16.mxu1 %v2896_v2 }
 0xbe8   : > { %2621 = vmatpush3.bf16.msra.mxu1 %v2620_v45 }
 0xbea   : > { %v2749_v33 = vpop.eup %2748 }
 0xbeb   : > { %v2051_v48 = vmul.f32 %v2749_v33, %v2043_v28 }
 0xbed   : > { %v2059_v50 = vmul.f32 %v2057_v46, %v2051_v48 }
 0xbef   : > { %v2063_v52 = vadd.f32 %v2061_v49, %v2059_v50 }
 0xbf1   : > { %2608 = vmatmul.mubr.msk.f32.vlgmr.msra.gmra.mrb[48].mxu1 %vm280_vm2, %v2063_v52 }
 0xcc4   : > { %v2157_v54 = vpop.f32.mrb[48].mxu1 }
 0xcc5   : > { %v2158_v55 = vadd.f32 %v2157_v54, %v2086_v53  ;;  %v2609_v56 = vpop.f32.mrb[49].mxu1 }
 0xcc7   : > { %2162 = vst.msk [vmem:[%s261_s26] sm:$0x1] %vm2161_vm11, %v2158_v55 }
 0xcc8   : > { %2819 = shalt.err (!%p2816_p11)
}
 0xcc9   : > { %s2820_s14 = scalar_lea.hbm %s3317_s10, 16  ;;  %s2824_s7 = scalar_lea.hbm %s3364_s5, 32 }
 0xcca   : > { %p2821_p13 = scmp.ne.s32.totalorder %s3317_s10, %s2820_s14  ;;  %p2825_p6 = scmp.lt.u32.totalorder %s3317_s10, %s3364_s5 }
 0xccb   : > { %p2826_p9 = scmp.lt.u32.totalorder %s2824_s7, %s2820_s14  ;;  %p2828_p12 = scmp.lt.u32.totalorder %s2820_s14, %s3317_s10 }
 0xccc   : > { %p2822_p0 = pnand %p2821_p13, %p3377_p1 }
 0xccd   : > { %p2827_p10 = por %p2826_p9, %p2825_p6 }
 0xcce   : > { %p2823_p5 = pneg %p2822_p0 }
 0xccf   : > { %p2829_p2 = por %p2828_p12, %p2827_p10 }
 0xcd1   : > { %p2830_p3 = pnand %p2829_p2, %p2823_p5 }
 0xcd3   : > { %2833 = shalt.err (!%p2830_p3)
}
 0xcd4   : > { %2630 = dma.vmem_to_hbm [thread:$0]  (%p3377_p1), %s3319_s6, 16, %s3317_s10, %s2164_s9  }
 0xcd5 PF: > { %p2647_p4 = scmp.ge.s32.totalorder %s2876_s21, 2  ;;  %s2188_s25 = sand.u32 1, %s2864_s18  }
 0xcd6   : > { %p3378_p7 = scmp.ne.s32.totalorder %s3369_s29, 0  ;;  %s2189_s26 = scalar_lea.sflag [#allocation6], %s2188_s25 }
 0xcd8   : > { %p2640_p8 = pnand %p2647_p4, %p3378_p7 }
 0xcda   : > { %2859 = dma.done.wait (!%p2640_p8), %s2189_s26, 16  }
 0xcdb   : > { %2861 = vsyncadd (!%p2640_p8), %s2189_s26, 4294967280  ;;  %p17_p11 = scmp.ge.s32.totalorder %s2954_s24, 4   ;;  %s3379_s18 = smov %s2868_s19 }
 0xcdc   : > { %s3380_s19 = smov %s2872_s20  ;;  %s3381_s20 = smov %s2965_s27 }
 0xcdd   : > { %s3382_s21 = smov %s2954_s24  ;;  %19 = sbr.rel (!%p17_p11) target bundleno = 5 (0x5), region = 87 }
 0xce4   :  { %2193 = vsyncpa [#allocation5], 1 }
 0xce5   :  { %2195 = vsyncpa [#allocation5 + $0x1], 1 }
 0xce6   :  { %2196 = vsyncpa [#allocation8], 1 }
 0xce7   :  { %2197 = vsyncpa [#allocation6], 1 }
 0xce8   :  { %2199 = vsyncpa [#allocation6 + $0x1], 1 }

</bundles_post_ra>
